<compile_context>
chip_gen: v6e
topology: v6e:2x2x1
jax: 0.10.0
libtpu: 0.0.40
codegen_flags: <defaults>
</compile_context>

<pallas_src>
import functools

import jax
import jax.numpy as jnp
import numpy as np
from jax import lax
from jax.experimental import pallas as pl
from jax.experimental.pallas import tpu as pltpu


# ---------------------------------------------------------------------------
# Helpers
# ---------------------------------------------------------------------------
def _round_up(x, m):
    return ((x + m - 1) // m) * m


def _pad_gate_cols(m, h, h_pad):
    """Pad the last (4*h) gate-blocked axis to 4*h_pad, preserving [i|f|g|o]."""
    lead = m.shape[:-1]
    m4 = m.reshape(lead + (4, h))
    pad = [(0, 0)] * (len(lead) + 1) + [(0, h_pad - h)]
    return jnp.pad(m4, pad).reshape(lead + (4 * h_pad,))


# ---------------------------------------------------------------------------
# Pallas kernel: the serial part of the LSTM recurrence.
# grid = (batch_blocks, time_blocks); time is the innermost ("arbitrary") axis.
# The hT/cT output blocks (constant index along time) act as the h/c carry.
# ---------------------------------------------------------------------------
def _lstm_decoder_kernel(gx_ref, whh_ref, h0_ref, c0_ref,
                         out_ref, hT_ref, cT_ref, *, t_real, t_blk):
    """gx_ref : (T_BLK, B_BLK, 4*Hp) f32  precomputed x@W_ih^T + b  (i,f,g,o)
       whh_ref: (Hp, 4*Hp)               recurrent weights, transposed
       h0/c0  : (B_BLK, Hp) f32          initial state for this batch block
       out_ref: (T_BLK, B_BLK, Hp) f32   per-step hidden states
       hT/cT  : (B_BLK, Hp) f32          final state; doubles as running carry
    """
    t = pl.program_id(1)

    @pl.when(t == 0)
    def _init():
        hT_ref[...] = h0_ref[...]
        cT_ref[...] = c0_ref[...]

    hp = hT_ref.shape[-1]

    def _step(s, carry):
        h = hT_ref[...]
        c = cT_ref[...]
        gates = gx_ref[s] + jnp.dot(h.astype(whh_ref.dtype), whh_ref[...],
                                    preferred_element_type=jnp.float32)
        i_g = jax.nn.sigmoid(gates[:, 0 * hp:1 * hp])
        f_g = jax.nn.sigmoid(gates[:, 1 * hp:2 * hp])
        g_g = jnp.tanh(gates[:, 2 * hp:3 * hp])
        o_g = jax.nn.sigmoid(gates[:, 3 * hp:4 * hp])
        c_new = f_g * c + i_g * g_g
        h_new = o_g * jnp.tanh(c_new)
        out_ref[s] = h_new.astype(out_ref.dtype)

        # Only advance the carry for real (un-padded) time steps so hT/cT hold
        # the true final state even when T' is not a multiple of T_BLK.
        @pl.when(t * t_blk + s < t_real)
        def _advance():
            hT_ref[...] = h_new
            cT_ref[...] = c_new

        return carry

    lax.fori_loop(0, t_blk, _step, 0, unroll=True)


def _run_lstm_pallas(gates_x, w_hh_t, h0, c0, *, t_real, t_blk, b_blk):
    """gates_x: (T_pad, B_pad, 4*Hp) f32; w_hh_t: (Hp, 4*Hp); h0/c0: (B_pad, Hp)."""
    T_pad, B_pad, G = gates_x.shape
    H_pad = G // 4
    n_t = T_pad // t_blk
    n_b = B_pad // b_blk

    out_shapes = (
        jax.ShapeDtypeStruct((T_pad, B_pad, H_pad), jnp.float32),  # all h_t
        jax.ShapeDtypeStruct((B_pad, H_pad), jnp.float32),         # final h
        jax.ShapeDtypeStruct((B_pad, H_pad), jnp.float32),         # final c
    )

    grid_spec = pltpu.PrefetchScalarGridSpec(
        num_scalar_prefetch=0,
        grid=(n_b, n_t),                                           # t innermost
        in_specs=[
            pl.BlockSpec((t_blk, b_blk, G), lambda b, t: (t, b, 0)),   # gates_x
            pl.BlockSpec((H_pad, G), lambda b, t: (0, 0)),             # W_hh^T
            pl.BlockSpec((b_blk, H_pad), lambda b, t: (b, 0)),         # h0
            pl.BlockSpec((b_blk, H_pad), lambda b, t: (b, 0)),         # c0
        ],
        out_specs=[
            pl.BlockSpec((t_blk, b_blk, H_pad), lambda b, t: (t, b, 0)),  # h_t
            pl.BlockSpec((b_blk, H_pad), lambda b, t: (b, 0)),            # hT
            pl.BlockSpec((b_blk, H_pad), lambda b, t: (b, 0)),            # cT
        ],
    )

    # Explicit VMEM budget: double-buffered inputs/outputs + headroom.
    # (Important on v7x: 64 MiB physical VMEM; v5e: 16 MiB scoped default.)
    bytes_gx = t_blk * b_blk * G * gates_x.dtype.itemsize
    bytes_w = H_pad * G * w_hh_t.dtype.itemsize
    bytes_state = b_blk * H_pad * 4
    bytes_out = t_blk * b_blk * H_pad * 4
    vmem_needed = 2 * (bytes_gx + bytes_w + 4 * bytes_state + bytes_out) + (4 << 20)
    vmem_limit = int(min(max(vmem_needed, 16 << 20), 64 << 20))

    flops = 2 * T_pad * B_pad * H_pad * G + 12 * T_pad * B_pad * H_pad
    transcendentals = 5 * T_pad * B_pad * H_pad
    bytes_accessed = (gates_x.size * gates_x.dtype.itemsize
                      + w_hh_t.size * w_hh_t.dtype.itemsize
                      + (h0.size + c0.size) * 4
                      + T_pad * B_pad * H_pad * 4
                      + 2 * B_pad * H_pad * 4)

    return pl.pallas_call(
        functools.partial(_lstm_decoder_kernel, t_real=t_real, t_blk=t_blk),
        out_shape=out_shapes,
        grid_spec=grid_spec,
        compiler_params=pltpu.CompilerParams(
            dimension_semantics=("parallel", "arbitrary"),   # batch || , time seq
            vmem_limit_bytes=vmem_limit),
        cost_estimate=pl.CostEstimate(
            flops=int(flops),
            transcendentals=int(transcendentals),
            bytes_accessed=int(bytes_accessed)),
    )(gates_x, w_hh_t, h0, c0)


# ---------------------------------------------------------------------------
# Decoder glue (mirrors the PyTorch forward semantics).
# ---------------------------------------------------------------------------
def reshape_state(state):
    h_state, c_state = state
    new_h = jnp.concatenate([h_state[:-1], h_state[1:]], axis=2)
    new_c = jnp.concatenate([c_state[:-1], c_state[1:]], axis=2)
    return (new_h, new_c)


def init_decoder_params(key, hidden_size, tgt_vocab_size, padding_idx):
    """Parameters in the same layout as the PyTorch module (nn.Embedding + nn.LSTM)."""
    ks = jax.random.split(key, 5)
    scale = 1.0 / np.sqrt(hidden_size)
    emb = jax.random.normal(ks[0], (tgt_vocab_size, hidden_size),
                            jnp.float32) * 0.1
    emb = emb.at[padding_idx].set(0.0)               # padding_idx row is zero
    w_ih = jax.random.uniform(ks[1], (4 * hidden_size, hidden_size),
                              jnp.float32, -scale, scale)
    w_hh = jax.random.uniform(ks[2], (4 * hidden_size, hidden_size),
                              jnp.float32, -scale, scale)
    b_ih = jax.random.uniform(ks[3], (4 * hidden_size,), jnp.float32,
                              -scale, scale)
    b_hh = jax.random.uniform(ks[4], (4 * hidden_size,), jnp.float32,
                              -scale, scale)
    return {"embedding": emb, "w_ih": w_ih, "w_hh": w_hh,
            "b_ih": b_ih, "b_hh": b_hh}


def decoder_forward(params, tgt, dec_state, encoder_outputs, src_lengths, *,
                    t_blk=8, b_blk=8, lane=128, matmul_dtype=jnp.float32):
    """tgt: (B, T) int32; dec_state: (h, c) each (L, B, H). attn=None.
    Dropout is eval-mode (identity).  Set matmul_dtype=jnp.bfloat16 on v6e/v7x
    for the MXU-fast path (f32 accumulation and gate math are kept regardless)."""
    del encoder_outputs, src_lengths   # only used by attn, which is None here
    # TODO(synk): reshape_state for a 2-layer state yields hidden 2H (inherited
    # from the reference semantics); it is never hit with these 1-layer weights.
    if dec_state[0].shape[0] == 2:
        dec_state = reshape_state(dec_state)

    if tgt.shape[1] > 1:
        tgt = tgt[:, :-1]

    emb = params["embedding"]
    H = emb.shape[1]
    B, T_dec = tgt.shape

    embedded = jnp.take(emb, tgt, axis=0)            # (B, T', H)
    # TODO(synk): nn.Dropout is stochastic in train mode; eval mode == identity.
    x = jnp.transpose(embedded, (1, 0, 2))           # (T', B, H) time-major

    # --- pad to the hardware tile: B -> mult of 8, H -> mult of 128 ----------
    H_pad = _round_up(H, lane)
    B_pad = _round_up(B, b_blk)
    T_pad = _round_up(T_dec, t_blk)

    w_ih_t = params["w_ih"].T                        # (H, 4H)
    w_hh_t = params["w_hh"].T                        # (H, 4H)
    bias = (params["b_ih"] + params["b_hh"])[None, :]  # (1, 4H)

    w_ih_t_pad = _pad_gate_cols(
        jnp.pad(w_ih_t, ((0, H_pad - H), (0, 0))), H, H_pad)   # (Hp, 4Hp)
    w_hh_t_pad = _pad_gate_cols(
        jnp.pad(w_hh_t, ((0, H_pad - H), (0, 0))), H, H_pad)   # (Hp, 4Hp)
    bias_pad = _pad_gate_cols(bias, H, H_pad)                  # (1, 4Hp)

    x_pad = jnp.pad(x, ((0, T_pad - T_dec), (0, B_pad - B), (0, H_pad - H)))
    h0 = jnp.pad(dec_state[0][0], ((0, B_pad - B), (0, H_pad - H)))
    c0 = jnp.pad(dec_state[1][0], ((0, B_pad - B), (0, H_pad - H)))

    # --- hoisted input projection: one big parallel matmul outside the loop --
    gates_x = (jnp.dot(x_pad.reshape(T_pad * B_pad, H_pad).astype(matmul_dtype),
                       w_ih_t_pad.astype(matmul_dtype),
                       preferred_element_type=jnp.float32)
               + bias_pad).reshape(T_pad, B_pad, 4 * H_pad)     # f32

    outs_pad, h_fin_pad, c_fin_pad = _run_lstm_pallas(
        gates_x, w_hh_t_pad.astype(matmul_dtype), h0, c0,
        t_real=T_dec, t_blk=t_blk, b_blk=b_blk)

    outputs = jnp.transpose(outs_pad[:T_dec, :B, :H], (1, 0, 2))  # (B, T', H)
    new_state = (h_fin_pad[None, :B, :H], c_fin_pad[None, :B, :H])
    return outputs, new_state


# ---------------------------------------------------------------------------
# Pure-JAX reference (lax.scan) for a correctness sanity check.
# ---------------------------------------------------------------------------
def _reference_forward(params, tgt, dec_state):
    if dec_state[0].shape[0] == 2:
        dec_state = reshape_state(dec_state)
    if tgt.shape[1] > 1:
        tgt = tgt[:, :-1]
    x = jnp.take(params["embedding"], tgt, axis=0)
    x = jnp.transpose(x, (1, 0, 2))
    H = params["embedding"].shape[1]
    w_ih_t = params["w_ih"].T
    w_hh_t = params["w_hh"].T
    b = (params["b_ih"] + params["b_hh"])[None, :]

    def step(carry, x_t):
        h, c = carry
        gates = x_t @ w_ih_t + h @ w_hh_t + b
        i = jax.nn.sigmoid(gates[:, :H])
        f = jax.nn.sigmoid(gates[:, H:2 * H])
        g = jnp.tanh(gates[:, 2 * H:3 * H])
        o = jax.nn.sigmoid(gates[:, 3 * H:])
        c = f * c + i * g
        h = o * jnp.tanh(c)
        return (h, c), h

    (hT, cT), ys = lax.scan(step, (dec_state[0][0], dec_state[1][0]), x)
    return jnp.transpose(ys, (1, 0, 2)), (hT[None], cT[None])


if __name__ == "__main__":
    padding_idx = 0

    def _check(B, T, H, V, key):
        k_par, k_tgt, k_h, k_c = jax.random.split(key, 4)
        params = init_decoder_params(k_par, H, V, padding_idx)
        tgt = jax.random.randint(k_tgt, (B, T), 0, V, dtype=jnp.int32)
        h0 = jax.random.normal(k_h, (1, B, H), jnp.float32) * 0.1
        c0 = jax.random.normal(k_c, (1, B, H), jnp.float32) * 0.1
        dec_state = (h0, c0)
        encoder_outputs = jnp.zeros((B, T, H), jnp.float32)  # unused (attn=None)
        src_lengths = jnp.full((B,), T, jnp.int32)            # unused (attn=None)

        outputs, new_state = decoder_forward(
            params, tgt, dec_state, encoder_outputs, src_lengths)
        jax.block_until_ready(outputs)
        jax.block_until_ready(new_state)

        ref_out, ref_state = _reference_forward(params, tgt, dec_state)
        # Tolerance accounts for TPU default (non-HIGHEST) matmul precision and
        # the re-associated / lane-padded accumulation in the optimized path.
        tol = dict(rtol=2e-3, atol=2e-3)
        np.testing.assert_allclose(np.asarray(outputs), np.asarray(ref_out), **tol)
        np.testing.assert_allclose(np.asarray(new_state[0]),
                                   np.asarray(ref_state[0]), **tol)
        np.testing.assert_allclose(np.asarray(new_state[1]),
                                   np.asarray(ref_state[1]), **tol)

        T_out = T - 1 if T > 1 else T
        assert outputs.shape == (B, T_out, H)
        assert new_state[0].shape == (1, B, H) and new_state[1].shape == (1, B, H)

    key = jax.random.PRNGKey(0)
    k1, k2 = jax.random.split(key)
    # Small shapes implied by the module (single block along both grid axes).
    _check(B=2, T=8, H=32, V=16, key=k1)
    # Multi-block grid: exercises the h/c carry across time blocks, the tail
    # masking (T' not a multiple of T_BLK), and multiple batch blocks.
    _check(B=10, T=21, H=32, V=30, key=k2)

    print("KERNEL_OK")
</pallas_src>

<mosaic_0001>
module attributes {stable_mosaic.version = 11 : i64} {
  func.func @_lstm_decoder_kernel(%arg0: i32, %arg1: i32, %arg2: memref<8x8x512xf32, #tpu.memory_space<vmem>>, %arg3: memref<128x512xf32, #tpu.memory_space<vmem>>, %arg4: memref<8x128xf32, #tpu.memory_space<vmem>>, %arg5: memref<8x128xf32, #tpu.memory_space<vmem>>, %arg6: memref<8x8x128xf32, #tpu.memory_space<vmem>>, %arg7: memref<8x128xf32, #tpu.memory_space<vmem>>, %arg8: memref<8x128xf32, #tpu.memory_space<vmem>>) attributes {dimension_semantics = [#tpu.dimension_semantics<parallel>, #tpu.dimension_semantics<arbitrary>], iteration_bounds = array<i64: 1, 1>, scalar_prefetch = 0 : i64, scratch_operands = 0 : i64, tpu.core_type = #tpu.core_type<tc>, window_params = [{transform_indices = @transform_0, window_bounds = array<i64: 8, 8, 512>}, {pipeline_mode = #tpu.pipeline_mode<synchronous>, transform_indices = @transform_1, window_bounds = array<i64: 128, 512>}, {transform_indices = @transform_2, window_bounds = array<i64: 8, 128>}, {transform_indices = @transform_3, window_bounds = array<i64: 8, 128>}, {transform_indices = @transform_4, window_bounds = array<i64: 8, 8, 128>}, {transform_indices = @transform_5, window_bounds = array<i64: 8, 128>}, {transform_indices = @transform_6, window_bounds = array<i64: 8, 128>}]} {
    %c0_i32 = arith.constant 0 : i32
    %0 = arith.cmpi eq, %arg1, %c0_i32 : i32
    %1 = arith.extui %0 : i1 to i32
    %c0_i32_0 = arith.constant 0 : i32
    %2 = arith.cmpi ne, %1, %c0_i32_0 : i32
    scf.if %2 {
      %c0_136 = arith.constant 0 : index
      %c0_137 = arith.constant 0 : index
      %339 = vector.load %arg4[%c0_136, %c0_137] : memref<8x128xf32, #tpu.memory_space<vmem>>, vector<8x128xf32>
      %c0_138 = arith.constant 0 : index
      %c0_139 = arith.constant 0 : index
      %340 = vector.load %arg7[%c0_138, %c0_139] : memref<8x128xf32, #tpu.memory_space<vmem>>, vector<8x128xf32>
      tpu.vector_store %arg7[%c0_138, %c0_139], %339 {strides = array<i32>} : memref<8x128xf32, #tpu.memory_space<vmem>>, vector<8x128xf32>,
      %c0_140 = arith.constant 0 : index
      %c0_141 = arith.constant 0 : index
      %341 = vector.load %arg5[%c0_140, %c0_141] : memref<8x128xf32, #tpu.memory_space<vmem>>, vector<8x128xf32>
      %c0_142 = arith.constant 0 : index
      %c0_143 = arith.constant 0 : index
      %342 = vector.load %arg8[%c0_142, %c0_143] : memref<8x128xf32, #tpu.memory_space<vmem>>, vector<8x128xf32>
      tpu.vector_store %arg8[%c0_142, %c0_143], %341 {strides = array<i32>} : memref<8x128xf32, #tpu.memory_space<vmem>>, vector<8x128xf32>,
    } else {
    }
    %c0_i32_1 = arith.constant 0 : i32
    %c0 = arith.constant 0 : index
    %c0_2 = arith.constant 0 : index
    %3 = vector.load %arg7[%c0, %c0_2] : memref<8x128xf32, #tpu.memory_space<vmem>>, vector<8x128xf32>
    %c0_3 = arith.constant 0 : index
    %c0_4 = arith.constant 0 : index
    %4 = vector.load %arg8[%c0_3, %c0_4] : memref<8x128xf32, #tpu.memory_space<vmem>>, vector<8x128xf32>
    %5 = arith.index_cast %c0_i32_1 : i32 to index
    %c0_5 = arith.constant 0 : index
    %c0_6 = arith.constant 0 : index
    %6 = vector.load %arg2[%5, %c0_5, %c0_6] : memref<8x8x512xf32, #tpu.memory_space<vmem>>, vector<1x8x512xf32>
    %7 = vector.shape_cast %6 : vector<1x8x512xf32> to vector<8x512xf32>
    %c0_7 = arith.constant 0 : index
    %c0_8 = arith.constant 0 : index
    %8 = vector.load %arg3[%c0_7, %c0_8] : memref<128x512xf32, #tpu.memory_space<vmem>>, vector<128x512xf32>
    %cst = arith.constant dense<0.000000e+00> : vector<8x512xf32>
    %9 = tpu.matmul %3, %8, %cst {dimension_numbers = #tpu.dot_dimension_numbers<[1], [0], [0], [1], [0, 0, 1, 1], [], []>} : vector<8x128xf32>, vector<128x512xf32>, vector<8x512xf32> -> vector<8x512xf32>
    %10 = arith.addf %7, %9 : vector<8x512xf32>
    %11 = vector.extract_strided_slice %10 {offsets = [0, 0], sizes = [8, 128], strides = [1, 1]} : vector<8x512xf32> to vector<8x128xf32>
    %12 = arith.negf %11 : vector<8x128xf32>
    %13 = math.exp %12 : vector<8x128xf32>
    %cst_9 = arith.constant 1.000000e+00 : f32
    %14 = vector.broadcast %cst_9 : f32 to vector<8x128xf32>
    %15 = arith.addf %14, %13 : vector<8x128xf32>
    %16 = arith.divf %14, %15 : vector<8x128xf32>
    %17 = vector.extract_strided_slice %10 {offsets = [0, 128], sizes = [8, 128], strides = [1, 1]} : vector<8x512xf32> to vector<8x128xf32>
    %18 = arith.negf %17 : vector<8x128xf32>
    %19 = math.exp %18 : vector<8x128xf32>
    %cst_10 = arith.constant 1.000000e+00 : f32
    %20 = vector.broadcast %cst_10 : f32 to vector<8x128xf32>
    %21 = arith.addf %20, %19 : vector<8x128xf32>
    %22 = arith.divf %20, %21 : vector<8x128xf32>
    %23 = vector.extract_strided_slice %10 {offsets = [0, 256], sizes = [8, 128], strides = [1, 1]} : vector<8x512xf32> to vector<8x128xf32>
    %24 = math.tanh %23 : vector<8x128xf32>
    %25 = vector.extract_strided_slice %10 {offsets = [0, 384], sizes = [8, 128], strides = [1, 1]} : vector<8x512xf32> to vector<8x128xf32>
    %26 = arith.negf %25 : vector<8x128xf32>
    %27 = math.exp %26 : vector<8x128xf32>
    %cst_11 = arith.constant 1.000000e+00 : f32
    %28 = vector.broadcast %cst_11 : f32 to vector<8x128xf32>
    %29 = arith.addf %28, %27 : vector<8x128xf32>
    %30 = arith.divf %28, %29 : vector<8x128xf32>
    %31 = arith.mulf %22, %4 : vector<8x128xf32>
    %32 = arith.mulf %16, %24 : vector<8x128xf32>
    %33 = arith.addf %31, %32 : vector<8x128xf32>
    %34 = math.tanh %33 : vector<8x128xf32>
    %35 = arith.mulf %30, %34 : vector<8x128xf32>
    %36 = arith.index_cast %c0_i32_1 : i32 to index
    %c0_12 = arith.constant 0 : index
    %c0_13 = arith.constant 0 : index
    %37 = vector.load %arg6[%36, %c0_12, %c0_13] : memref<8x8x128xf32, #tpu.memory_space<vmem>>, vector<1x8x128xf32>
    %38 = vector.shape_cast %37 : vector<1x8x128xf32> to vector<8x128xf32>
    %39 = vector.shape_cast %35 : vector<8x128xf32> to vector<1x8x128xf32>
    tpu.vector_store %arg6[%36, %c0_12, %c0_13], %39 {strides = array<i32>} : memref<8x8x128xf32, #tpu.memory_space<vmem>>, vector<1x8x128xf32>,
    %c8_i32 = arith.constant 8 : i32
    %40 = arith.muli %arg1, %c8_i32 : i32
    %41 = arith.addi %40, %c0_i32_1 : i32
    %c7_i32 = arith.constant 7 : i32
    %42 = arith.cmpi slt, %41, %c7_i32 : i32
    %43 = arith.extui %42 : i1 to i32
    %c0_i32_14 = arith.constant 0 : i32
    %44 = arith.cmpi ne, %43, %c0_i32_14 : i32
    scf.if %44 {
      %c0_136 = arith.constant 0 : index
      %c0_137 = arith.constant 0 : index
      %339 = vector.load %arg7[%c0_136, %c0_137] : memref<8x128xf32, #tpu.memory_space<vmem>>, vector<8x128xf32>
      tpu.vector_store %arg7[%c0_136, %c0_137], %35 {strides = array<i32>} : memref<8x128xf32, #tpu.memory_space<vmem>>, vector<8x128xf32>,
      %c0_138 = arith.constant 0 : index
      %c0_139 = arith.constant 0 : index
      %340 = vector.load %arg8[%c0_138, %c0_139] : memref<8x128xf32, #tpu.memory_space<vmem>>, vector<8x128xf32>
      tpu.vector_store %arg8[%c0_138, %c0_139], %33 {strides = array<i32>} : memref<8x128xf32, #tpu.memory_space<vmem>>, vector<8x128xf32>,
    } else {
    }
    %c1_i32 = arith.constant 1 : i32
    %c0_15 = arith.constant 0 : index
    %c0_16 = arith.constant 0 : index
    %45 = vector.load %arg7[%c0_15, %c0_16] : memref<8x128xf32, #tpu.memory_space<vmem>>, vector<8x128xf32>
    %c0_17 = arith.constant 0 : index
    %c0_18 = arith.constant 0 : index
    %46 = vector.load %arg8[%c0_17, %c0_18] : memref<8x128xf32, #tpu.memory_space<vmem>>, vector<8x128xf32>
    %47 = arith.index_cast %c1_i32 : i32 to index
    %c0_19 = arith.constant 0 : index
    %c0_20 = arith.constant 0 : index
    %48 = vector.load %arg2[%47, %c0_19, %c0_20] : memref<8x8x512xf32, #tpu.memory_space<vmem>>, vector<1x8x512xf32>
    %49 = vector.shape_cast %48 : vector<1x8x512xf32> to vector<8x512xf32>
    %c0_21 = arith.constant 0 : index
    %c0_22 = arith.constant 0 : index
    %50 = vector.load %arg3[%c0_21, %c0_22] : memref<128x512xf32, #tpu.memory_space<vmem>>, vector<128x512xf32>
    %cst_23 = arith.constant dense<0.000000e+00> : vector<8x512xf32>
    %51 = tpu.matmul %45, %50, %cst_23 {dimension_numbers = #tpu.dot_dimension_numbers<[1], [0], [0], [1], [0, 0, 1, 1], [], []>} : vector<8x128xf32>, vector<128x512xf32>, vector<8x512xf32> -> vector<8x512xf32>
    %52 = arith.addf %49, %51 : vector<8x512xf32>
    %53 = vector.extract_strided_slice %52 {offsets = [0, 0], sizes = [8, 128], strides = [1, 1]} : vector<8x512xf32> to vector<8x128xf32>
    %54 = arith.negf %53 : vector<8x128xf32>
    %55 = math.exp %54 : vector<8x128xf32>
    %cst_24 = arith.constant 1.000000e+00 : f32
    %56 = vector.broadcast %cst_24 : f32 to vector<8x128xf32>
    %57 = arith.addf %56, %55 : vector<8x128xf32>
    %58 = arith.divf %56, %57 : vector<8x128xf32>
    %59 = vector.extract_strided_slice %52 {offsets = [0, 128], sizes = [8, 128], strides = [1, 1]} : vector<8x512xf32> to vector<8x128xf32>
    %60 = arith.negf %59 : vector<8x128xf32>
    %61 = math.exp %60 : vector<8x128xf32>
    %cst_25 = arith.constant 1.000000e+00 : f32
    %62 = vector.broadcast %cst_25 : f32 to vector<8x128xf32>
    %63 = arith.addf %62, %61 : vector<8x128xf32>
    %64 = arith.divf %62, %63 : vector<8x128xf32>
    %65 = vector.extract_strided_slice %52 {offsets = [0, 256], sizes = [8, 128], strides = [1, 1]} : vector<8x512xf32> to vector<8x128xf32>
    %66 = math.tanh %65 : vector<8x128xf32>
    %67 = vector.extract_strided_slice %52 {offsets = [0, 384], sizes = [8, 128], strides = [1, 1]} : vector<8x512xf32> to vector<8x128xf32>
    %68 = arith.negf %67 : vector<8x128xf32>
    %69 = math.exp %68 : vector<8x128xf32>
    %cst_26 = arith.constant 1.000000e+00 : f32
    %70 = vector.broadcast %cst_26 : f32 to vector<8x128xf32>
    %71 = arith.addf %70, %69 : vector<8x128xf32>
    %72 = arith.divf %70, %71 : vector<8x128xf32>
    %73 = arith.mulf %64, %46 : vector<8x128xf32>
    %74 = arith.mulf %58, %66 : vector<8x128xf32>
    %75 = arith.addf %73, %74 : vector<8x128xf32>
    %76 = math.tanh %75 : vector<8x128xf32>
    %77 = arith.mulf %72, %76 : vector<8x128xf32>
    %78 = arith.index_cast %c1_i32 : i32 to index
    %c0_27 = arith.constant 0 : index
    %c0_28 = arith.constant 0 : index
    %79 = vector.load %arg6[%78, %c0_27, %c0_28] : memref<8x8x128xf32, #tpu.memory_space<vmem>>, vector<1x8x128xf32>
    %80 = vector.shape_cast %79 : vector<1x8x128xf32> to vector<8x128xf32>
    %81 = vector.shape_cast %77 : vector<8x128xf32> to vector<1x8x128xf32>
    tpu.vector_store %arg6[%78, %c0_27, %c0_28], %81 {strides = array<i32>} : memref<8x8x128xf32, #tpu.memory_space<vmem>>, vector<1x8x128xf32>,
    %c8_i32_29 = arith.constant 8 : i32
    %82 = arith.muli %arg1, %c8_i32_29 : i32
    %83 = arith.addi %82, %c1_i32 : i32
    %c7_i32_30 = arith.constant 7 : i32
    %84 = arith.cmpi slt, %83, %c7_i32_30 : i32
    %85 = arith.extui %84 : i1 to i32
    %c0_i32_31 = arith.constant 0 : i32
    %86 = arith.cmpi ne, %85, %c0_i32_31 : i32
    scf.if %86 {
      %c0_136 = arith.constant 0 : index
      %c0_137 = arith.constant 0 : index
      %339 = vector.load %arg7[%c0_136, %c0_137] : memref<8x128xf32, #tpu.memory_space<vmem>>, vector<8x128xf32>
      tpu.vector_store %arg7[%c0_136, %c0_137], %77 {strides = array<i32>} : memref<8x128xf32, #tpu.memory_space<vmem>>, vector<8x128xf32>,
      %c0_138 = arith.constant 0 : index
      %c0_139 = arith.constant 0 : index
      %340 = vector.load %arg8[%c0_138, %c0_139] : memref<8x128xf32, #tpu.memory_space<vmem>>, vector<8x128xf32>
      tpu.vector_store %arg8[%c0_138, %c0_139], %75 {strides = array<i32>} : memref<8x128xf32, #tpu.memory_space<vmem>>, vector<8x128xf32>,
    } else {
    }
    %c2_i32 = arith.constant 2 : i32
    %c0_32 = arith.constant 0 : index
    %c0_33 = arith.constant 0 : index
    %87 = vector.load %arg7[%c0_32, %c0_33] : memref<8x128xf32, #tpu.memory_space<vmem>>, vector<8x128xf32>
    %c0_34 = arith.constant 0 : index
    %c0_35 = arith.constant 0 : index
    %88 = vector.load %arg8[%c0_34, %c0_35] : memref<8x128xf32, #tpu.memory_space<vmem>>, vector<8x128xf32>
    %89 = arith.index_cast %c2_i32 : i32 to index
    %c0_36 = arith.constant 0 : index
    %c0_37 = arith.constant 0 : index
    %90 = vector.load %arg2[%89, %c0_36, %c0_37] : memref<8x8x512xf32, #tpu.memory_space<vmem>>, vector<1x8x512xf32>
    %91 = vector.shape_cast %90 : vector<1x8x512xf32> to vector<8x512xf32>
    %c0_38 = arith.constant 0 : index
    %c0_39 = arith.constant 0 : index
    %92 = vector.load %arg3[%c0_38, %c0_39] : memref<128x512xf32, #tpu.memory_space<vmem>>, vector<128x512xf32>
    %cst_40 = arith.constant dense<0.000000e+00> : vector<8x512xf32>
    %93 = tpu.matmul %87, %92, %cst_40 {dimension_numbers = #tpu.dot_dimension_numbers<[1], [0], [0], [1], [0, 0, 1, 1], [], []>} : vector<8x128xf32>, vector<128x512xf32>, vector<8x512xf32> -> vector<8x512xf32>
    %94 = arith.addf %91, %93 : vector<8x512xf32>
    %95 = vector.extract_strided_slice %94 {offsets = [0, 0], sizes = [8, 128], strides = [1, 1]} : vector<8x512xf32> to vector<8x128xf32>
    %96 = arith.negf %95 : vector<8x128xf32>
    %97 = math.exp %96 : vector<8x128xf32>
    %cst_41 = arith.constant 1.000000e+00 : f32
    %98 = vector.broadcast %cst_41 : f32 to vector<8x128xf32>
    %99 = arith.addf %98, %97 : vector<8x128xf32>
    %100 = arith.divf %98, %99 : vector<8x128xf32>
    %101 = vector.extract_strided_slice %94 {offsets = [0, 128], sizes = [8, 128], strides = [1, 1]} : vector<8x512xf32> to vector<8x128xf32>
    %102 = arith.negf %101 : vector<8x128xf32>
    %103 = math.exp %102 : vector<8x128xf32>
    %cst_42 = arith.constant 1.000000e+00 : f32
    %104 = vector.broadcast %cst_42 : f32 to vector<8x128xf32>
    %105 = arith.addf %104, %103 : vector<8x128xf32>
    %106 = arith.divf %104, %105 : vector<8x128xf32>
    %107 = vector.extract_strided_slice %94 {offsets = [0, 256], sizes = [8, 128], strides = [1, 1]} : vector<8x512xf32> to vector<8x128xf32>
    %108 = math.tanh %107 : vector<8x128xf32>
    %109 = vector.extract_strided_slice %94 {offsets = [0, 384], sizes = [8, 128], strides = [1, 1]} : vector<8x512xf32> to vector<8x128xf32>
    %110 = arith.negf %109 : vector<8x128xf32>
    %111 = math.exp %110 : vector<8x128xf32>
    %cst_43 = arith.constant 1.000000e+00 : f32
    %112 = vector.broadcast %cst_43 : f32 to vector<8x128xf32>
    %113 = arith.addf %112, %111 : vector<8x128xf32>
    %114 = arith.divf %112, %113 : vector<8x128xf32>
    %115 = arith.mulf %106, %88 : vector<8x128xf32>
    %116 = arith.mulf %100, %108 : vector<8x128xf32>
    %117 = arith.addf %115, %116 : vector<8x128xf32>
    %118 = math.tanh %117 : vector<8x128xf32>
    %119 = arith.mulf %114, %118 : vector<8x128xf32>
    %120 = arith.index_cast %c2_i32 : i32 to index
    %c0_44 = arith.constant 0 : index
    %c0_45 = arith.constant 0 : index
    %121 = vector.load %arg6[%120, %c0_44, %c0_45] : memref<8x8x128xf32, #tpu.memory_space<vmem>>, vector<1x8x128xf32>
    %122 = vector.shape_cast %121 : vector<1x8x128xf32> to vector<8x128xf32>
    %123 = vector.shape_cast %119 : vector<8x128xf32> to vector<1x8x128xf32>
    tpu.vector_store %arg6[%120, %c0_44, %c0_45], %123 {strides = array<i32>} : memref<8x8x128xf32, #tpu.memory_space<vmem>>, vector<1x8x128xf32>,
    %c8_i32_46 = arith.constant 8 : i32
    %124 = arith.muli %arg1, %c8_i32_46 : i32
    %125 = arith.addi %124, %c2_i32 : i32
    %c7_i32_47 = arith.constant 7 : i32
    %126 = arith.cmpi slt, %125, %c7_i32_47 : i32
    %127 = arith.extui %126 : i1 to i32
    %c0_i32_48 = arith.constant 0 : i32
    %128 = arith.cmpi ne, %127, %c0_i32_48 : i32
    scf.if %128 {
      %c0_136 = arith.constant 0 : index
      %c0_137 = arith.constant 0 : index
      %339 = vector.load %arg7[%c0_136, %c0_137] : memref<8x128xf32, #tpu.memory_space<vmem>>, vector<8x128xf32>
      tpu.vector_store %arg7[%c0_136, %c0_137], %119 {strides = array<i32>} : memref<8x128xf32, #tpu.memory_space<vmem>>, vector<8x128xf32>,
      %c0_138 = arith.constant 0 : index
      %c0_139 = arith.constant 0 : index
      %340 = vector.load %arg8[%c0_138, %c0_139] : memref<8x128xf32, #tpu.memory_space<vmem>>, vector<8x128xf32>
      tpu.vector_store %arg8[%c0_138, %c0_139], %117 {strides = array<i32>} : memref<8x128xf32, #tpu.memory_space<vmem>>, vector<8x128xf32>,
    } else {
    }
    %c3_i32 = arith.constant 3 : i32
    %c0_49 = arith.constant 0 : index
    %c0_50 = arith.constant 0 : index
    %129 = vector.load %arg7[%c0_49, %c0_50] : memref<8x128xf32, #tpu.memory_space<vmem>>, vector<8x128xf32>
    %c0_51 = arith.constant 0 : index
    %c0_52 = arith.constant 0 : index
    %130 = vector.load %arg8[%c0_51, %c0_52] : memref<8x128xf32, #tpu.memory_space<vmem>>, vector<8x128xf32>
    %131 = arith.index_cast %c3_i32 : i32 to index
    %c0_53 = arith.constant 0 : index
    %c0_54 = arith.constant 0 : index
    %132 = vector.load %arg2[%131, %c0_53, %c0_54] : memref<8x8x512xf32, #tpu.memory_space<vmem>>, vector<1x8x512xf32>
    %133 = vector.shape_cast %132 : vector<1x8x512xf32> to vector<8x512xf32>
    %c0_55 = arith.constant 0 : index
    %c0_56 = arith.constant 0 : index
    %134 = vector.load %arg3[%c0_55, %c0_56] : memref<128x512xf32, #tpu.memory_space<vmem>>, vector<128x512xf32>
    %cst_57 = arith.constant dense<0.000000e+00> : vector<8x512xf32>
    %135 = tpu.matmul %129, %134, %cst_57 {dimension_numbers = #tpu.dot_dimension_numbers<[1], [0], [0], [1], [0, 0, 1, 1], [], []>} : vector<8x128xf32>, vector<128x512xf32>, vector<8x512xf32> -> vector<8x512xf32>
    %136 = arith.addf %133, %135 : vector<8x512xf32>
    %137 = vector.extract_strided_slice %136 {offsets = [0, 0], sizes = [8, 128], strides = [1, 1]} : vector<8x512xf32> to vector<8x128xf32>
    %138 = arith.negf %137 : vector<8x128xf32>
    %139 = math.exp %138 : vector<8x128xf32>
    %cst_58 = arith.constant 1.000000e+00 : f32
    %140 = vector.broadcast %cst_58 : f32 to vector<8x128xf32>
    %141 = arith.addf %140, %139 : vector<8x128xf32>
    %142 = arith.divf %140, %141 : vector<8x128xf32>
    %143 = vector.extract_strided_slice %136 {offsets = [0, 128], sizes = [8, 128], strides = [1, 1]} : vector<8x512xf32> to vector<8x128xf32>
    %144 = arith.negf %143 : vector<8x128xf32>
    %145 = math.exp %144 : vector<8x128xf32>
    %cst_59 = arith.constant 1.000000e+00 : f32
    %146 = vector.broadcast %cst_59 : f32 to vector<8x128xf32>
    %147 = arith.addf %146, %145 : vector<8x128xf32>
    %148 = arith.divf %146, %147 : vector<8x128xf32>
    %149 = vector.extract_strided_slice %136 {offsets = [0, 256], sizes = [8, 128], strides = [1, 1]} : vector<8x512xf32> to vector<8x128xf32>
    %150 = math.tanh %149 : vector<8x128xf32>
    %151 = vector.extract_strided_slice %136 {offsets = [0, 384], sizes = [8, 128], strides = [1, 1]} : vector<8x512xf32> to vector<8x128xf32>
    %152 = arith.negf %151 : vector<8x128xf32>
    %153 = math.exp %152 : vector<8x128xf32>
    %cst_60 = arith.constant 1.000000e+00 : f32
    %154 = vector.broadcast %cst_60 : f32 to vector<8x128xf32>
    %155 = arith.addf %154, %153 : vector<8x128xf32>
    %156 = arith.divf %154, %155 : vector<8x128xf32>
    %157 = arith.mulf %148, %130 : vector<8x128xf32>
    %158 = arith.mulf %142, %150 : vector<8x128xf32>
    %159 = arith.addf %157, %158 : vector<8x128xf32>
    %160 = math.tanh %159 : vector<8x128xf32>
    %161 = arith.mulf %156, %160 : vector<8x128xf32>
    %162 = arith.index_cast %c3_i32 : i32 to index
    %c0_61 = arith.constant 0 : index
    %c0_62 = arith.constant 0 : index
    %163 = vector.load %arg6[%162, %c0_61, %c0_62] : memref<8x8x128xf32, #tpu.memory_space<vmem>>, vector<1x8x128xf32>
    %164 = vector.shape_cast %163 : vector<1x8x128xf32> to vector<8x128xf32>
    %165 = vector.shape_cast %161 : vector<8x128xf32> to vector<1x8x128xf32>
    tpu.vector_store %arg6[%162, %c0_61, %c0_62], %165 {strides = array<i32>} : memref<8x8x128xf32, #tpu.memory_space<vmem>>, vector<1x8x128xf32>,
    %c8_i32_63 = arith.constant 8 : i32
    %166 = arith.muli %arg1, %c8_i32_63 : i32
    %167 = arith.addi %166, %c3_i32 : i32
    %c7_i32_64 = arith.constant 7 : i32
    %168 = arith.cmpi slt, %167, %c7_i32_64 : i32
    %169 = arith.extui %168 : i1 to i32
    %c0_i32_65 = arith.constant 0 : i32
    %170 = arith.cmpi ne, %169, %c0_i32_65 : i32
    scf.if %170 {
      %c0_136 = arith.constant 0 : index
      %c0_137 = arith.constant 0 : index
      %339 = vector.load %arg7[%c0_136, %c0_137] : memref<8x128xf32, #tpu.memory_space<vmem>>, vector<8x128xf32>
      tpu.vector_store %arg7[%c0_136, %c0_137], %161 {strides = array<i32>} : memref<8x128xf32, #tpu.memory_space<vmem>>, vector<8x128xf32>,
      %c0_138 = arith.constant 0 : index
      %c0_139 = arith.constant 0 : index
      %340 = vector.load %arg8[%c0_138, %c0_139] : memref<8x128xf32, #tpu.memory_space<vmem>>, vector<8x128xf32>
      tpu.vector_store %arg8[%c0_138, %c0_139], %159 {strides = array<i32>} : memref<8x128xf32, #tpu.memory_space<vmem>>, vector<8x128xf32>,
    } else {
    }
    %c4_i32 = arith.constant 4 : i32
    %c0_66 = arith.constant 0 : index
    %c0_67 = arith.constant 0 : index
    %171 = vector.load %arg7[%c0_66, %c0_67] : memref<8x128xf32, #tpu.memory_space<vmem>>, vector<8x128xf32>
    %c0_68 = arith.constant 0 : index
    %c0_69 = arith.constant 0 : index
    %172 = vector.load %arg8[%c0_68, %c0_69] : memref<8x128xf32, #tpu.memory_space<vmem>>, vector<8x128xf32>
    %173 = arith.index_cast %c4_i32 : i32 to index
    %c0_70 = arith.constant 0 : index
    %c0_71 = arith.constant 0 : index
    %174 = vector.load %arg2[%173, %c0_70, %c0_71] : memref<8x8x512xf32, #tpu.memory_space<vmem>>, vector<1x8x512xf32>
    %175 = vector.shape_cast %174 : vector<1x8x512xf32> to vector<8x512xf32>
    %c0_72 = arith.constant 0 : index
    %c0_73 = arith.constant 0 : index
    %176 = vector.load %arg3[%c0_72, %c0_73] : memref<128x512xf32, #tpu.memory_space<vmem>>, vector<128x512xf32>
    %cst_74 = arith.constant dense<0.000000e+00> : vector<8x512xf32>
    %177 = tpu.matmul %171, %176, %cst_74 {dimension_numbers = #tpu.dot_dimension_numbers<[1], [0], [0], [1], [0, 0, 1, 1], [], []>} : vector<8x128xf32>, vector<128x512xf32>, vector<8x512xf32> -> vector<8x512xf32>
    %178 = arith.addf %175, %177 : vector<8x512xf32>
    %179 = vector.extract_strided_slice %178 {offsets = [0, 0], sizes = [8, 128], strides = [1, 1]} : vector<8x512xf32> to vector<8x128xf32>
    %180 = arith.negf %179 : vector<8x128xf32>
    %181 = math.exp %180 : vector<8x128xf32>
    %cst_75 = arith.constant 1.000000e+00 : f32
    %182 = vector.broadcast %cst_75 : f32 to vector<8x128xf32>
    %183 = arith.addf %182, %181 : vector<8x128xf32>
    %184 = arith.divf %182, %183 : vector<8x128xf32>
    %185 = vector.extract_strided_slice %178 {offsets = [0, 128], sizes = [8, 128], strides = [1, 1]} : vector<8x512xf32> to vector<8x128xf32>
    %186 = arith.negf %185 : vector<8x128xf32>
    %187 = math.exp %186 : vector<8x128xf32>
    %cst_76 = arith.constant 1.000000e+00 : f32
    %188 = vector.broadcast %cst_76 : f32 to vector<8x128xf32>
    %189 = arith.addf %188, %187 : vector<8x128xf32>
    %190 = arith.divf %188, %189 : vector<8x128xf32>
    %191 = vector.extract_strided_slice %178 {offsets = [0, 256], sizes = [8, 128], strides = [1, 1]} : vector<8x512xf32> to vector<8x128xf32>
    %192 = math.tanh %191 : vector<8x128xf32>
    %193 = vector.extract_strided_slice %178 {offsets = [0, 384], sizes = [8, 128], strides = [1, 1]} : vector<8x512xf32> to vector<8x128xf32>
    %194 = arith.negf %193 : vector<8x128xf32>
    %195 = math.exp %194 : vector<8x128xf32>
    %cst_77 = arith.constant 1.000000e+00 : f32
    %196 = vector.broadcast %cst_77 : f32 to vector<8x128xf32>
    %197 = arith.addf %196, %195 : vector<8x128xf32>
    %198 = arith.divf %196, %197 : vector<8x128xf32>
    %199 = arith.mulf %190, %172 : vector<8x128xf32>
    %200 = arith.mulf %184, %192 : vector<8x128xf32>
    %201 = arith.addf %199, %200 : vector<8x128xf32>
    %202 = math.tanh %201 : vector<8x128xf32>
    %203 = arith.mulf %198, %202 : vector<8x128xf32>
    %204 = arith.index_cast %c4_i32 : i32 to index
    %c0_78 = arith.constant 0 : index
    %c0_79 = arith.constant 0 : index
    %205 = vector.load %arg6[%204, %c0_78, %c0_79] : memref<8x8x128xf32, #tpu.memory_space<vmem>>, vector<1x8x128xf32>
    %206 = vector.shape_cast %205 : vector<1x8x128xf32> to vector<8x128xf32>
    %207 = vector.shape_cast %203 : vector<8x128xf32> to vector<1x8x128xf32>
    tpu.vector_store %arg6[%204, %c0_78, %c0_79], %207 {strides = array<i32>} : memref<8x8x128xf32, #tpu.memory_space<vmem>>, vector<1x8x128xf32>,
    %c8_i32_80 = arith.constant 8 : i32
    %208 = arith.muli %arg1, %c8_i32_80 : i32
    %209 = arith.addi %208, %c4_i32 : i32
    %c7_i32_81 = arith.constant 7 : i32
    %210 = arith.cmpi slt, %209, %c7_i32_81 : i32
    %211 = arith.extui %210 : i1 to i32
    %c0_i32_82 = arith.constant 0 : i32
    %212 = arith.cmpi ne, %211, %c0_i32_82 : i32
    scf.if %212 {
      %c0_136 = arith.constant 0 : index
      %c0_137 = arith.constant 0 : index
      %339 = vector.load %arg7[%c0_136, %c0_137] : memref<8x128xf32, #tpu.memory_space<vmem>>, vector<8x128xf32>
      tpu.vector_store %arg7[%c0_136, %c0_137], %203 {strides = array<i32>} : memref<8x128xf32, #tpu.memory_space<vmem>>, vector<8x128xf32>,
      %c0_138 = arith.constant 0 : index
      %c0_139 = arith.constant 0 : index
      %340 = vector.load %arg8[%c0_138, %c0_139] : memref<8x128xf32, #tpu.memory_space<vmem>>, vector<8x128xf32>
      tpu.vector_store %arg8[%c0_138, %c0_139], %201 {strides = array<i32>} : memref<8x128xf32, #tpu.memory_space<vmem>>, vector<8x128xf32>,
    } else {
    }
    %c5_i32 = arith.constant 5 : i32
    %c0_83 = arith.constant 0 : index
    %c0_84 = arith.constant 0 : index
    %213 = vector.load %arg7[%c0_83, %c0_84] : memref<8x128xf32, #tpu.memory_space<vmem>>, vector<8x128xf32>
    %c0_85 = arith.constant 0 : index
    %c0_86 = arith.constant 0 : index
    %214 = vector.load %arg8[%c0_85, %c0_86] : memref<8x128xf32, #tpu.memory_space<vmem>>, vector<8x128xf32>
    %215 = arith.index_cast %c5_i32 : i32 to index
    %c0_87 = arith.constant 0 : index
    %c0_88 = arith.constant 0 : index
    %216 = vector.load %arg2[%215, %c0_87, %c0_88] : memref<8x8x512xf32, #tpu.memory_space<vmem>>, vector<1x8x512xf32>
    %217 = vector.shape_cast %216 : vector<1x8x512xf32> to vector<8x512xf32>
    %c0_89 = arith.constant 0 : index
    %c0_90 = arith.constant 0 : index
    %218 = vector.load %arg3[%c0_89, %c0_90] : memref<128x512xf32, #tpu.memory_space<vmem>>, vector<128x512xf32>
    %cst_91 = arith.constant dense<0.000000e+00> : vector<8x512xf32>
    %219 = tpu.matmul %213, %218, %cst_91 {dimension_numbers = #tpu.dot_dimension_numbers<[1], [0], [0], [1], [0, 0, 1, 1], [], []>} : vector<8x128xf32>, vector<128x512xf32>, vector<8x512xf32> -> vector<8x512xf32>
    %220 = arith.addf %217, %219 : vector<8x512xf32>
    %221 = vector.extract_strided_slice %220 {offsets = [0, 0], sizes = [8, 128], strides = [1, 1]} : vector<8x512xf32> to vector<8x128xf32>
    %222 = arith.negf %221 : vector<8x128xf32>
    %223 = math.exp %222 : vector<8x128xf32>
    %cst_92 = arith.constant 1.000000e+00 : f32
    %224 = vector.broadcast %cst_92 : f32 to vector<8x128xf32>
    %225 = arith.addf %224, %223 : vector<8x128xf32>
    %226 = arith.divf %224, %225 : vector<8x128xf32>
    %227 = vector.extract_strided_slice %220 {offsets = [0, 128], sizes = [8, 128], strides = [1, 1]} : vector<8x512xf32> to vector<8x128xf32>
    %228 = arith.negf %227 : vector<8x128xf32>
    %229 = math.exp %228 : vector<8x128xf32>
    %cst_93 = arith.constant 1.000000e+00 : f32
    %230 = vector.broadcast %cst_93 : f32 to vector<8x128xf32>
    %231 = arith.addf %230, %229 : vector<8x128xf32>
    %232 = arith.divf %230, %231 : vector<8x128xf32>
    %233 = vector.extract_strided_slice %220 {offsets = [0, 256], sizes = [8, 128], strides = [1, 1]} : vector<8x512xf32> to vector<8x128xf32>
    %234 = math.tanh %233 : vector<8x128xf32>
    %235 = vector.extract_strided_slice %220 {offsets = [0, 384], sizes = [8, 128], strides = [1, 1]} : vector<8x512xf32> to vector<8x128xf32>
    %236 = arith.negf %235 : vector<8x128xf32>
    %237 = math.exp %236 : vector<8x128xf32>
    %cst_94 = arith.constant 1.000000e+00 : f32
    %238 = vector.broadcast %cst_94 : f32 to vector<8x128xf32>
    %239 = arith.addf %238, %237 : vector<8x128xf32>
    %240 = arith.divf %238, %239 : vector<8x128xf32>
    %241 = arith.mulf %232, %214 : vector<8x128xf32>
    %242 = arith.mulf %226, %234 : vector<8x128xf32>
    %243 = arith.addf %241, %242 : vector<8x128xf32>
    %244 = math.tanh %243 : vector<8x128xf32>
    %245 = arith.mulf %240, %244 : vector<8x128xf32>
    %246 = arith.index_cast %c5_i32 : i32 to index
    %c0_95 = arith.constant 0 : index
    %c0_96 = arith.constant 0 : index
    %247 = vector.load %arg6[%246, %c0_95, %c0_96] : memref<8x8x128xf32, #tpu.memory_space<vmem>>, vector<1x8x128xf32>
    %248 = vector.shape_cast %247 : vector<1x8x128xf32> to vector<8x128xf32>
    %249 = vector.shape_cast %245 : vector<8x128xf32> to vector<1x8x128xf32>
    tpu.vector_store %arg6[%246, %c0_95, %c0_96], %249 {strides = array<i32>} : memref<8x8x128xf32, #tpu.memory_space<vmem>>, vector<1x8x128xf32>,
    %c8_i32_97 = arith.constant 8 : i32
    %250 = arith.muli %arg1, %c8_i32_97 : i32
    %251 = arith.addi %250, %c5_i32 : i32
    %c7_i32_98 = arith.constant 7 : i32
    %252 = arith.cmpi slt, %251, %c7_i32_98 : i32
    %253 = arith.extui %252 : i1 to i32
    %c0_i32_99 = arith.constant 0 : i32
    %254 = arith.cmpi ne, %253, %c0_i32_99 : i32
    scf.if %254 {
      %c0_136 = arith.constant 0 : index
      %c0_137 = arith.constant 0 : index
      %339 = vector.load %arg7[%c0_136, %c0_137] : memref<8x128xf32, #tpu.memory_space<vmem>>, vector<8x128xf32>
      tpu.vector_store %arg7[%c0_136, %c0_137], %245 {strides = array<i32>} : memref<8x128xf32, #tpu.memory_space<vmem>>, vector<8x128xf32>,
      %c0_138 = arith.constant 0 : index
      %c0_139 = arith.constant 0 : index
      %340 = vector.load %arg8[%c0_138, %c0_139] : memref<8x128xf32, #tpu.memory_space<vmem>>, vector<8x128xf32>
      tpu.vector_store %arg8[%c0_138, %c0_139], %243 {strides = array<i32>} : memref<8x128xf32, #tpu.memory_space<vmem>>, vector<8x128xf32>,
    } else {
    }
    %c6_i32 = arith.constant 6 : i32
    %c0_100 = arith.constant 0 : index
    %c0_101 = arith.constant 0 : index
    %255 = vector.load %arg7[%c0_100, %c0_101] : memref<8x128xf32, #tpu.memory_space<vmem>>, vector<8x128xf32>
    %c0_102 = arith.constant 0 : index
    %c0_103 = arith.constant 0 : index
    %256 = vector.load %arg8[%c0_102, %c0_103] : memref<8x128xf32, #tpu.memory_space<vmem>>, vector<8x128xf32>
    %257 = arith.index_cast %c6_i32 : i32 to index
    %c0_104 = arith.constant 0 : index
    %c0_105 = arith.constant 0 : index
    %258 = vector.load %arg2[%257, %c0_104, %c0_105] : memref<8x8x512xf32, #tpu.memory_space<vmem>>, vector<1x8x512xf32>
    %259 = vector.shape_cast %258 : vector<1x8x512xf32> to vector<8x512xf32>
    %c0_106 = arith.constant 0 : index
    %c0_107 = arith.constant 0 : index
    %260 = vector.load %arg3[%c0_106, %c0_107] : memref<128x512xf32, #tpu.memory_space<vmem>>, vector<128x512xf32>
    %cst_108 = arith.constant dense<0.000000e+00> : vector<8x512xf32>
    %261 = tpu.matmul %255, %260, %cst_108 {dimension_numbers = #tpu.dot_dimension_numbers<[1], [0], [0], [1], [0, 0, 1, 1], [], []>} : vector<8x128xf32>, vector<128x512xf32>, vector<8x512xf32> -> vector<8x512xf32>
    %262 = arith.addf %259, %261 : vector<8x512xf32>
    %263 = vector.extract_strided_slice %262 {offsets = [0, 0], sizes = [8, 128], strides = [1, 1]} : vector<8x512xf32> to vector<8x128xf32>
    %264 = arith.negf %263 : vector<8x128xf32>
    %265 = math.exp %264 : vector<8x128xf32>
    %cst_109 = arith.constant 1.000000e+00 : f32
    %266 = vector.broadcast %cst_109 : f32 to vector<8x128xf32>
    %267 = arith.addf %266, %265 : vector<8x128xf32>
    %268 = arith.divf %266, %267 : vector<8x128xf32>
    %269 = vector.extract_strided_slice %262 {offsets = [0, 128], sizes = [8, 128], strides = [1, 1]} : vector<8x512xf32> to vector<8x128xf32>
    %270 = arith.negf %269 : vector<8x128xf32>
    %271 = math.exp %270 : vector<8x128xf32>
    %cst_110 = arith.constant 1.000000e+00 : f32
    %272 = vector.broadcast %cst_110 : f32 to vector<8x128xf32>
    %273 = arith.addf %272, %271 : vector<8x128xf32>
    %274 = arith.divf %272, %273 : vector<8x128xf32>
    %275 = vector.extract_strided_slice %262 {offsets = [0, 256], sizes = [8, 128], strides = [1, 1]} : vector<8x512xf32> to vector<8x128xf32>
    %276 = math.tanh %275 : vector<8x128xf32>
    %277 = vector.extract_strided_slice %262 {offsets = [0, 384], sizes = [8, 128], strides = [1, 1]} : vector<8x512xf32> to vector<8x128xf32>
    %278 = arith.negf %277 : vector<8x128xf32>
    %279 = math.exp %278 : vector<8x128xf32>
    %cst_111 = arith.constant 1.000000e+00 : f32
    %280 = vector.broadcast %cst_111 : f32 to vector<8x128xf32>
    %281 = arith.addf %280, %279 : vector<8x128xf32>
    %282 = arith.divf %280, %281 : vector<8x128xf32>
    %283 = arith.mulf %274, %256 : vector<8x128xf32>
    %284 = arith.mulf %268, %276 : vector<8x128xf32>
    %285 = arith.addf %283, %284 : vector<8x128xf32>
    %286 = math.tanh %285 : vector<8x128xf32>
    %287 = arith.mulf %282, %286 : vector<8x128xf32>
    %288 = arith.index_cast %c6_i32 : i32 to index
    %c0_112 = arith.constant 0 : index
    %c0_113 = arith.constant 0 : index
    %289 = vector.load %arg6[%288, %c0_112, %c0_113] : memref<8x8x128xf32, #tpu.memory_space<vmem>>, vector<1x8x128xf32>
    %290 = vector.shape_cast %289 : vector<1x8x128xf32> to vector<8x128xf32>
    %291 = vector.shape_cast %287 : vector<8x128xf32> to vector<1x8x128xf32>
    tpu.vector_store %arg6[%288, %c0_112, %c0_113], %291 {strides = array<i32>} : memref<8x8x128xf32, #tpu.memory_space<vmem>>, vector<1x8x128xf32>,
    %c8_i32_114 = arith.constant 8 : i32
    %292 = arith.muli %arg1, %c8_i32_114 : i32
    %293 = arith.addi %292, %c6_i32 : i32
    %c7_i32_115 = arith.constant 7 : i32
    %294 = arith.cmpi slt, %293, %c7_i32_115 : i32
    %295 = arith.extui %294 : i1 to i32
    %c0_i32_116 = arith.constant 0 : i32
    %296 = arith.cmpi ne, %295, %c0_i32_116 : i32
    scf.if %296 {
      %c0_136 = arith.constant 0 : index
      %c0_137 = arith.constant 0 : index
      %339 = vector.load %arg7[%c0_136, %c0_137] : memref<8x128xf32, #tpu.memory_space<vmem>>, vector<8x128xf32>
      tpu.vector_store %arg7[%c0_136, %c0_137], %287 {strides = array<i32>} : memref<8x128xf32, #tpu.memory_space<vmem>>, vector<8x128xf32>,
      %c0_138 = arith.constant 0 : index
      %c0_139 = arith.constant 0 : index
      %340 = vector.load %arg8[%c0_138, %c0_139] : memref<8x128xf32, #tpu.memory_space<vmem>>, vector<8x128xf32>
      tpu.vector_store %arg8[%c0_138, %c0_139], %285 {strides = array<i32>} : memref<8x128xf32, #tpu.memory_space<vmem>>, vector<8x128xf32>,
    } else {
    }
    %c7_i32_117 = arith.constant 7 : i32
    %c0_118 = arith.constant 0 : index
    %c0_119 = arith.constant 0 : index
    %297 = vector.load %arg7[%c0_118, %c0_119] : memref<8x128xf32, #tpu.memory_space<vmem>>, vector<8x128xf32>
    %c0_120 = arith.constant 0 : index
    %c0_121 = arith.constant 0 : index
    %298 = vector.load %arg8[%c0_120, %c0_121] : memref<8x128xf32, #tpu.memory_space<vmem>>, vector<8x128xf32>
    %299 = arith.index_cast %c7_i32_117 : i32 to index
    %c0_122 = arith.constant 0 : index
    %c0_123 = arith.constant 0 : index
    %300 = vector.load %arg2[%299, %c0_122, %c0_123] : memref<8x8x512xf32, #tpu.memory_space<vmem>>, vector<1x8x512xf32>
    %301 = vector.shape_cast %300 : vector<1x8x512xf32> to vector<8x512xf32>
    %c0_124 = arith.constant 0 : index
    %c0_125 = arith.constant 0 : index
    %302 = vector.load %arg3[%c0_124, %c0_125] : memref<128x512xf32, #tpu.memory_space<vmem>>, vector<128x512xf32>
    %cst_126 = arith.constant dense<0.000000e+00> : vector<8x512xf32>
    %303 = tpu.matmul %297, %302, %cst_126 {dimension_numbers = #tpu.dot_dimension_numbers<[1], [0], [0], [1], [0, 0, 1, 1], [], []>} : vector<8x128xf32>, vector<128x512xf32>, vector<8x512xf32> -> vector<8x512xf32>
    %304 = arith.addf %301, %303 : vector<8x512xf32>
    %305 = vector.extract_strided_slice %304 {offsets = [0, 0], sizes = [8, 128], strides = [1, 1]} : vector<8x512xf32> to vector<8x128xf32>
    %306 = arith.negf %305 : vector<8x128xf32>
    %307 = math.exp %306 : vector<8x128xf32>
    %cst_127 = arith.constant 1.000000e+00 : f32
    %308 = vector.broadcast %cst_127 : f32 to vector<8x128xf32>
    %309 = arith.addf %308, %307 : vector<8x128xf32>
    %310 = arith.divf %308, %309 : vector<8x128xf32>
    %311 = vector.extract_strided_slice %304 {offsets = [0, 128], sizes = [8, 128], strides = [1, 1]} : vector<8x512xf32> to vector<8x128xf32>
    %312 = arith.negf %311 : vector<8x128xf32>
    %313 = math.exp %312 : vector<8x128xf32>
    %cst_128 = arith.constant 1.000000e+00 : f32
    %314 = vector.broadcast %cst_128 : f32 to vector<8x128xf32>
    %315 = arith.addf %314, %313 : vector<8x128xf32>
    %316 = arith.divf %314, %315 : vector<8x128xf32>
    %317 = vector.extract_strided_slice %304 {offsets = [0, 256], sizes = [8, 128], strides = [1, 1]} : vector<8x512xf32> to vector<8x128xf32>
    %318 = math.tanh %317 : vector<8x128xf32>
    %319 = vector.extract_strided_slice %304 {offsets = [0, 384], sizes = [8, 128], strides = [1, 1]} : vector<8x512xf32> to vector<8x128xf32>
    %320 = arith.negf %319 : vector<8x128xf32>
    %321 = math.exp %320 : vector<8x128xf32>
    %cst_129 = arith.constant 1.000000e+00 : f32
    %322 = vector.broadcast %cst_129 : f32 to vector<8x128xf32>
    %323 = arith.addf %322, %321 : vector<8x128xf32>
    %324 = arith.divf %322, %323 : vector<8x128xf32>
    %325 = arith.mulf %316, %298 : vector<8x128xf32>
    %326 = arith.mulf %310, %318 : vector<8x128xf32>
    %327 = arith.addf %325, %326 : vector<8x128xf32>
    %328 = math.tanh %327 : vector<8x128xf32>
    %329 = arith.mulf %324, %328 : vector<8x128xf32>
    %330 = arith.index_cast %c7_i32_117 : i32 to index
    %c0_130 = arith.constant 0 : index
    %c0_131 = arith.constant 0 : index
    %331 = vector.load %arg6[%330, %c0_130, %c0_131] : memref<8x8x128xf32, #tpu.memory_space<vmem>>, vector<1x8x128xf32>
    %332 = vector.shape_cast %331 : vector<1x8x128xf32> to vector<8x128xf32>
    %333 = vector.shape_cast %329 : vector<8x128xf32> to vector<1x8x128xf32>
    tpu.vector_store %arg6[%330, %c0_130, %c0_131], %333 {strides = array<i32>} : memref<8x8x128xf32, #tpu.memory_space<vmem>>, vector<1x8x128xf32>,
    %c8_i32_132 = arith.constant 8 : i32
    %334 = arith.muli %arg1, %c8_i32_132 : i32
    %335 = arith.addi %334, %c7_i32_117 : i32
    %c7_i32_133 = arith.constant 7 : i32
    %336 = arith.cmpi slt, %335, %c7_i32_133 : i32
    %337 = arith.extui %336 : i1 to i32
    %c0_i32_134 = arith.constant 0 : i32
    %338 = arith.cmpi ne, %337, %c0_i32_134 : i32
    scf.if %338 {
      %c0_136 = arith.constant 0 : index
      %c0_137 = arith.constant 0 : index
      %339 = vector.load %arg7[%c0_136, %c0_137] : memref<8x128xf32, #tpu.memory_space<vmem>>, vector<8x128xf32>
      tpu.vector_store %arg7[%c0_136, %c0_137], %329 {strides = array<i32>} : memref<8x128xf32, #tpu.memory_space<vmem>>, vector<8x128xf32>,
      %c0_138 = arith.constant 0 : index
      %c0_139 = arith.constant 0 : index
      %340 = vector.load %arg8[%c0_138, %c0_139] : memref<8x128xf32, #tpu.memory_space<vmem>>, vector<8x128xf32>
      tpu.vector_store %arg8[%c0_138, %c0_139], %327 {strides = array<i32>} : memref<8x128xf32, #tpu.memory_space<vmem>>, vector<8x128xf32>,
    } else {
    }
    %c8_i32_135 = arith.constant 8 : i32
    return
  }
  func.func @transform_0(%arg0: i32, %arg1: i32) -> (i32, i32, i32) {
    %c0_i32 = arith.constant 0 : i32
    %c0_i32_0 = arith.constant 0 : i32
    return %arg1, %arg0, %c0_i32 : i32, i32, i32
  }
  func.func @transform_1(%arg0: i32, %arg1: i32) -> (i32, i32) {
    %c0_i32 = arith.constant 0 : i32
    %c0_i32_0 = arith.constant 0 : i32
    %c0_i32_1 = arith.constant 0 : i32
    return %c0_i32, %c0_i32_0 : i32, i32
  }
  func.func @transform_2(%arg0: i32, %arg1: i32) -> (i32, i32) {
    %c0_i32 = arith.constant 0 : i32
    %c0_i32_0 = arith.constant 0 : i32
    return %arg0, %c0_i32 : i32, i32
  }
  func.func @transform_3(%arg0: i32, %arg1: i32) -> (i32, i32) {
    %c0_i32 = arith.constant 0 : i32
    %c0_i32_0 = arith.constant 0 : i32
    return %arg0, %c0_i32 : i32, i32
  }
  func.func @transform_4(%arg0: i32, %arg1: i32) -> (i32, i32, i32) {
    %c0_i32 = arith.constant 0 : i32
    %c0_i32_0 = arith.constant 0 : i32
    return %arg1, %arg0, %c0_i32 : i32, i32, i32
  }
  func.func @transform_5(%arg0: i32, %arg1: i32) -> (i32, i32) {
    %c0_i32 = arith.constant 0 : i32
    %c0_i32_0 = arith.constant 0 : i32
    return %arg0, %c0_i32 : i32, i32
  }
  func.func @transform_6(%arg0: i32, %arg1: i32) -> (i32, i32) {
    %c0_i32 = arith.constant 0 : i32
    %c0_i32_0 = arith.constant 0 : i32
    return %arg0, %c0_i32 : i32, i32
  }
}

</mosaic_0001>

<bundles_post_ra>
// kernel: tpu_custom_call.1
= control target key start
LH: loop header
LB: loop body
LE: loop exit
PB: predicated region body
PF: predicated region fallthrough
CT: control target
= control target key end

     0   :  { %12 = vsyncpa [#allocation3], 0  ;;  %s3292_s0 = inlined_call_operand.hbm [shape: f32[8,8,512], index: 0, kind: input, shape index: {}]   ;;  %s3293_s1 = inlined_call_operand.hbm [shape: f32[128,512], index: 1, kind: input, shape index: {}]   ;;  %s3294_s2 = inlined_call_operand.hbm [shape: f32[8,128], index: 2, kind: input, shape index: {}]   ;;  %s3295_s3 = inlined_call_operand.hbm [shape: f32[8,128], index: 3, kind: input, shape index: {}]   ;;  %s3296_s4 = inlined_call_operand.hbm [shape: f32[8,8,128], index: 4, kind: output, shape index: {0}]   ;;  %s3297_s5 = inlined_call_operand.hbm [shape: f32[8,128], index: 5, kind: output, shape index: {1}]   ;;  %s3298_s6 = inlined_call_operand.hbm [shape: f32[8,128], index: 6, kind: output, shape index: {2}]  }
   0x1   :  { %13 = vsyncpa [#allocation6], 0 }
   0x2   :  { %14 = vsyncpa [#allocation9], 0 }
   0x3   :  { %15 = vsyncpa [#allocation4], 0 }
   0x4   :  { %16 = vsyncpa [#allocation12], 0  ;;  %s2439_s21 = smov [#allocation5]   ;;  %s2440_s23 = smov [#allocation2]  }
   0x5   :  { %s34_s22 = sshll.u32 %s2439_s21, 4  ;;  %s22_s24 = sshll.u32 %s2440_s23, 4  ;;  %s35_s22 = int_to_ptr.vmem [resolvable:$true] %s34_s22  ;;  %s23_s24 = int_to_ptr.vmem [resolvable:$true] %s22_s24 }
   0x6   :  { %s2297_s25 = scalar_lea.vmem %s35_s22, 8192  ;;  %p2302_p1 = scmp.lt.s32.totalorder %s35_s22, %s35_s22 }
   0x7   :  { %p2298_p0 = scmp.ne.s32.totalorder %s35_s22, %s2297_s25  ;;  %p2303_p2 = scmp.lt.s32.totalorder %s2297_s25, %s2297_s25 }
   0x9   :  { %p2304_p3 = por %p2303_p2, %p2302_p1 }
   0xb   :  { %p2305_p4 = pnand %p2304_p3, %p2298_p0 }
   0xd   :  { %2308 = shalt.err (!%p2305_p4)
}
   0xe   :  { %s2441_s26 = smov 512   ;;  %s2442_s27 = smov 32  }
   0xf   :  { %40 = dma.hbm_to_vmem [thread:$0]  %s3293_s1, 8192, %s35_s22, [#allocation6], %s2441_s26, %s2441_s26, %s2442_s27  }
  0x10   :  { %s2317_s30 = scalar_lea.vmem %s23_s24, 4096  ;;  %p2322_p6 = scmp.lt.s32.totalorder %s23_s24, %s23_s24 }
  0x11   :  { %p2318_p5 = scmp.ne.s32.totalorder %s23_s24, %s2317_s30  ;;  %p2323_p7 = scmp.lt.s32.totalorder %s2317_s30, %s2317_s30 }
  0x13   :  { %p2324_p8 = por %p2323_p7, %p2322_p6 }
  0x15   :  { %p2325_p9 = pnand %p2324_p8, %p2318_p5 }
  0x17   :  { %2328 = shalt.err (!%p2325_p9)
}
  0x18   :  { %28 = dma.hbm_to_vmem [thread:$0]  %s3292_s0, 4096, %s23_s24, [#allocation3], %s2441_s26, %s2441_s26, %s2442_s27  }
  0x19   :  { %s2443_s9 = smov [#allocation7]   ;;  %s2444_s11 = smov [#allocation8]  }
  0x1a   :  { %s47_s10 = sshll.u32 %s2443_s9, 4  ;;  %s57_s12 = sshll.u32 %s2444_s11, 4  ;;  %s48_s10 = int_to_ptr.vmem [resolvable:$true] %s47_s10  ;;  %s58_s12 = int_to_ptr.vmem [resolvable:$true] %s57_s12 }
  0x1b   :  { %s2337_s13 = scalar_lea.vmem %s48_s10, 128  ;;  %p2342_p11 = scmp.lt.s32.totalorder %s48_s10, %s48_s10 }
  0x1c   :  { %p2338_p10 = scmp.ne.s32.totalorder %s48_s10, %s2337_s13  ;;  %p2343_p12 = scmp.lt.s32.totalorder %s2337_s13, %s2337_s13 }
  0x1e   :  { %p2344_p13 = por %p2343_p12, %p2342_p11 }
  0x20   :  { %p2345_p0 = pnand %p2344_p13, %p2338_p10 }
  0x22   :  { %2348 = shalt.err (!%p2345_p0)
}
  0x23   :  { %50 = dma.hbm_to_vmem [thread:$0]  %s3294_s2, 128, %s48_s10, [#allocation6]  }
  0x24   :  { %s2357_s15 = scalar_lea.vmem %s58_s12, 128  ;;  %p2362_p2 = scmp.lt.s32.totalorder %s58_s12, %s58_s12 }
  0x25   :  { %p2358_p1 = scmp.ne.s32.totalorder %s58_s12, %s2357_s15  ;;  %p2363_p3 = scmp.lt.s32.totalorder %s2357_s15, %s2357_s15 }
  0x27   :  { %p2364_p4 = por %p2363_p3, %p2362_p2 }
  0x29   :  { %p2365_p5 = pnand %p2364_p4, %p2358_p1 }
  0x2b   :  { %2368 = shalt.err (!%p2365_p5)
}
  0x2c   :  { %60 = dma.hbm_to_vmem [thread:$0]  %s3295_s3, 128, %s58_s12, [#allocation9]  }
  0x2d   :  { %2429 = dma.done.wait [#allocation3], 4096  }
  0x2e   :  { %2430 = vsyncadd [#allocation3], 4294963200 }
  0x2f   :  { %2431 = dma.done.wait [#allocation6], 8320  }
  0x30   :  { %2432 = vsyncadd [#allocation6], 4294958976 }
  0x31   :  { %2433 = dma.done.wait [#allocation9], 128  }
  0x32   :  { %2434 = vsyncadd [#allocation9], 4294967168  ;;  %v3299_v0 = vmov 0.0   ;;  %v2500_v1 = vld [vmem:[#allocation5 + $0x1e8] sm:$0xff]  ;;  %v2502_v2 = vld [vmem:[#allocation5 + $0x1e0] sm:$0xff]  ;;  %s2446_s2 = smov [#allocation11]  }
  0x33   :  { %215 = vmatprep.mubr.f32.mxu0 %v3299_v0  ;;  %286 = vmatprep.mubr.f32.mxu1 %v3299_v0  ;;  %3374 = vst [vmem:[#allocation19_spill] sm:$0xff] %v2500_v1  ;;  %v2504_v3 = vld [vmem:[#allocation5 + $0x1c8] sm:$0xff]  ;;  %v2507_v4 = vld [vmem:[#allocation5 + $0x1c0] sm:$0xff]  ;;  %v2521_v9 = vld [vmem:[#allocation5 + $0x1f8] sm:$0xff]  ;;  %s2097_s3 = sshll.u32 %s2446_s2, 4  ;;  %s2098_s3 = int_to_ptr.vmem [resolvable:$true] %s2097_s3 }
  0x34   :  { %151 = vmatprep.subr.mxu0 %v2500_v1  ;;  %v2510_v5 = vld [vmem:[#allocation5 + $0x1a8] sm:$0xff]  ;;  %v2513_v6 = vld [vmem:[#allocation5 + $0x1a0] sm:$0xff]  ;;  %3375 = vst [vmem:[#allocation20_spill] sm:$0xff] %v2521_v9  ;;  %222 = vmatprep.subr.mxu1 %v2521_v9  ;;  %v2527_v11 = vld [vmem:[#allocation5 + $0x1f0] sm:$0xff]  ;;  %s2369_s17 = scalar_lea.vmem %s2098_s3, 128  ;;  %p2374_p7 = scmp.lt.s32.totalorder %s2098_s3, %s2098_s3 }
  0x35   :  { %152 = vmatpush1.msra.mxu0 %v2502_v2  ;;  %v2516_v7 = vld [vmem:[#allocation5 + $0x188] sm:$0xff]  ;;  %v2519_v8 = vld [vmem:[#allocation5 + $0x180] sm:$0xff]  ;;  %223 = vmatpush1.msra.mxu1 %v2527_v11  ;;  %v2533_v13 = vld [vmem:[#allocation5 + $0x1d8] sm:$0xff]  ;;  %p2370_p6 = scmp.ne.s32.totalorder %s2098_s3, %s2369_s17  ;;  %p2375_p8 = scmp.lt.s32.totalorder %s2369_s17, %s2369_s17 }
  0x36   :  { %153 = vmatprep.subr.mxu0 %v2504_v3  ;;  %v2524_v10 = vld [vmem:[#allocation5 + $0x168] sm:$0xff]  ;;  %v2530_v12 = vld [vmem:[#allocation5 + $0x160] sm:$0xff]  ;;  %v2535_v14 = vld [vmem:[#allocation5 + $0x1d0] sm:$0xff]  ;;  %224 = vmatprep.subr.mxu1 %v2533_v13 }
  0x37   :  { %154 = vmatpush1.msra.mxu0 %v2507_v4  ;;  %v2538_v15 = vld [vmem:[#allocation5 + $0x148] sm:$0xff]  ;;  %v2541_v16 = vld [vmem:[#allocation5 + $0x1b8] sm:$0xff]  ;;  %v2544_v17 = vld [vmem:[#allocation5 + $0x140] sm:$0xff]  ;;  %225 = vmatpush1.msra.mxu1 %v2535_v14  ;;  %p2376_p9 = por %p2375_p8, %p2374_p7 }
  0x38   :  { %155 = vmatprep.subr.mxu0 %v2510_v5  ;;  %v2547_v18 = vld [vmem:[#allocation5 + $0x1b0] sm:$0xff]  ;;  %v2549_v19 = vld [vmem:[#allocation5 + $0x198] sm:$0xff]  ;;  %v2552_v20 = vld [vmem:[#allocation5 + $0x128] sm:$0xff]  ;;  %226 = vmatprep.subr.mxu1 %v2541_v16 }
  0x39   :  { %156 = vmatpush1.msra.mxu0 %v2513_v6  ;;  %v2555_v21 = vld [vmem:[#allocation5 + $0x190] sm:$0xff]  ;;  %v2558_v22 = vld [vmem:[#allocation5 + $0x120] sm:$0xff]  ;;  %227 = vmatpush1.msra.mxu1 %v2547_v18  ;;  %v2561_v23 = vld [vmem:[#allocation5 + $0x178] sm:$0xff]  ;;  %p2377_p10 = pnand %p2376_p9, %p2370_p6 }
  0x3a   :  { %157 = vmatprep.subr.mxu0 %v2516_v7  ;;  %v2564_v24 = vld [vmem:[#allocation5 + $0x108] sm:$0xff]  ;;  %228 = vmatprep.subr.mxu1 %v2549_v19  ;;  %v2567_v25 = vld [vmem:[#allocation5 + $0x170] sm:$0xff]  ;;  %v2570_v26 = vld [vmem:[#allocation5 + $0x100] sm:$0xff] }
  0x3b   :  { %158 = vmatpush1.msra.mxu0 %v2519_v8  ;;  %229 = vmatpush1.msra.mxu1 %v2555_v21  ;;  %v2573_v27 = vld [vmem:[#allocation5 + $0x158] sm:$0xff]  ;;  %v2576_v28 = vld [vmem:[#allocation5 + $0xe8] sm:$0xff]  ;;  %v2579_v29 = vld [vmem:[#allocation5 + $0x150] sm:$0xff] }
  0x3c   :  { %159 = vmatprep.subr.mxu0 %v2524_v10  ;;  %230 = vmatprep.subr.mxu1 %v2561_v23  ;;  %v2582_v30 = vld [vmem:[#allocation5 + $0xe0] sm:$0xff]  ;;  %v2585_v31 = vld [vmem:[#allocation5 + $0x138] sm:$0xff]  ;;  %v2588_v32 = vld [vmem:[#allocation5 + $0xc8] sm:$0xff] }
  0x3d   :  { %160 = vmatpush1.msra.mxu0 %v2530_v12  ;;  %231 = vmatpush1.msra.mxu1 %v2567_v25  ;;  %v2591_v33 = vld [vmem:[#allocation5 + $0x130] sm:$0xff]  ;;  %v2594_v34 = vld [vmem:[#allocation5 + $0xc0] sm:$0xff]  ;;  %v2597_v35 = vld [vmem:[#allocation5 + $0x118] sm:$0xff] }
  0x3e   :  { %161 = vmatprep.subr.mxu0 %v2538_v15  ;;  %232 = vmatprep.subr.mxu1 %v2573_v27  ;;  %v2600_v36 = vld [vmem:[#allocation5 + $0xa8] sm:$0xff]  ;;  %v2603_v37 = vld [vmem:[#allocation5 + $0x110] sm:$0xff]  ;;  %v2606_v38 = vld [vmem:[#allocation5 + $0xa0] sm:$0xff] }
  0x3f   :  { %162 = vmatpush1.msra.mxu0 %v2544_v17  ;;  %233 = vmatpush1.msra.mxu1 %v2579_v29  ;;  %v2609_v39 = vld [vmem:[#allocation5 + $0xf8] sm:$0xff]  ;;  %v2612_v40 = vld [vmem:[#allocation5 + $0x88] sm:$0xff]  ;;  %v2615_v41 = vld [vmem:[#allocation5 + $0xf0] sm:$0xff] }
  0x40   :  { %163 = vmatprep.subr.mxu0 %v2552_v20  ;;  %234 = vmatprep.subr.mxu1 %v2585_v31  ;;  %v2618_v42 = vld [vmem:[#allocation5 + $0x80] sm:$0xff]  ;;  %v2621_v43 = vld [vmem:[#allocation5 + $0xd8] sm:$0xff]  ;;  %v2624_v44 = vld [vmem:[#allocation5 + $0x68] sm:$0xff] }
  0x41   :  { %164 = vmatpush1.msra.mxu0 %v2558_v22  ;;  %235 = vmatpush1.msra.mxu1 %v2591_v33  ;;  %3376 = vst [vmem:[#allocation21_spill] sm:$0xff] %v2618_v42  ;;  %3377 = vst [vmem:[#allocation22_spill] sm:$0xff] %v2624_v44  ;;  %v2627_v45 = vld [vmem:[#allocation5 + $0xd0] sm:$0xff]  ;;  %v2630_v46 = vld [vmem:[#allocation5 + $0x60] sm:$0xff] }
  0x42   :  { %165 = vmatprep.subr.mxu0 %v2564_v24  ;;  %236 = vmatprep.subr.mxu1 %v2597_v35  ;;  %3378 = vst [vmem:[#allocation23_spill] sm:$0xff] %v2630_v46  ;;  %v2633_v47 = vld [vmem:[#allocation5 + $0xb8] sm:$0xff]  ;;  %v2636_v48 = vld [vmem:[#allocation5 + $0x48] sm:$0xff]  ;;  %v2639_v49 = vld [vmem:[#allocation5 + $0xb0] sm:$0xff] }
  0x43   :  { %166 = vmatpush1.msra.mxu0 %v2570_v26  ;;  %237 = vmatpush1.msra.mxu1 %v2603_v37  ;;  %3379 = vst [vmem:[#allocation24_spill] sm:$0xff] %v2636_v48  ;;  %v2642_v50 = vld [vmem:[#allocation5 + $0x40] sm:$0xff]  ;;  %v2645_v51 = vld [vmem:[#allocation5 + $0x98] sm:$0xff]  ;;  %v2648_v52 = vld [vmem:[#allocation5 + $0x28] sm:$0xff] }
  0x44   :  { %167 = vmatprep.subr.mxu0 %v2576_v28  ;;  %238 = vmatprep.subr.mxu1 %v2609_v39  ;;  %3380 = vst [vmem:[#allocation25_spill] sm:$0xff] %v2642_v50  ;;  %3381 = vst [vmem:[#allocation26_spill] sm:$0xff] %v2648_v52  ;;  %v2651_v53 = vld [vmem:[#allocation5 + $0x90] sm:$0xff]  ;;  %v2654_v54 = vld [vmem:[#allocation5 + $0x20] sm:$0xff] }
  0x45   :  { %168 = vmatpush1.msra.mxu0 %v2582_v30  ;;  %239 = vmatpush1.msra.mxu1 %v2615_v41  ;;  %3382 = vst [vmem:[#allocation27_spill] sm:$0xff] %v2651_v53  ;;  %3383 = vst [vmem:[#allocation28_spill] sm:$0xff] %v2654_v54  ;;  %v2657_v55 = vld [vmem:[#allocation5 + $0x78] sm:$0xff]  ;;  %v2660_v56 = vld [vmem:[#allocation5 + $0x8] sm:$0xff] }
  0x46   :  { %169 = vmatprep.subr.mxu0 %v2588_v32  ;;  %240 = vmatprep.subr.mxu1 %v2621_v43  ;;  %3384 = vst [vmem:[#allocation29_spill] sm:$0xff] %v2657_v55  ;;  %3385 = vst [vmem:[#allocation30_spill] sm:$0xff] %v2660_v56  ;;  %v2663_v57 = vld [vmem:[#allocation5 + $0x70] sm:$0xff]  ;;  %v2666_v58 = vld [vmem:[#allocation5] sm:$0xff] }
  0x47   :  { %170 = vmatpush1.msra.mxu0 %v2594_v34  ;;  %241 = vmatpush1.msra.mxu1 %v2627_v45  ;;  %3386 = vst [vmem:[#allocation31_spill] sm:$0xff] %v2663_v57  ;;  %3387 = vst [vmem:[#allocation32_spill] sm:$0xff] %v2666_v58  ;;  %v2669_v59 = vld [vmem:[#allocation5 + $0x58] sm:$0xff]  ;;  %v77_v60 = vld [vmem:[#allocation7] sm:$0xff] }
  0x48   :  { %171 = vmatprep.subr.mxu0 %v2600_v36  ;;  %242 = vmatprep.subr.mxu1 %v2633_v47  ;;  %3388 = vst [vmem:[#allocation33_spill] sm:$0xff] %v2669_v59  ;;  %v2673_v61 = vld [vmem:[#allocation5 + $0x50] sm:$0xff]  ;;  %v2677_v62 = vld [vmem:[#allocation5 + $0x38] sm:$0xff] }
  0x49   :  { %172 = vmatpush1.msra.mxu0 %v2606_v38  ;;  %243 = vmatpush1.msra.mxu1 %v2639_v49  ;;  %3389 = vst [vmem:[#allocation34_spill] sm:$0xff] %v2673_v61  ;;  %3390 = vst [vmem:[#allocation35_spill] sm:$0xff] %v2677_v62  ;;  %v2681_v63 = vld [vmem:[#allocation5 + $0x30] sm:$0xff]  ;;  %v2684_v0 = vld [vmem:[#allocation5 + $0x18] sm:$0xff] }
  0x4a   :  { %173 = vmatprep.subr.mxu0 %v2612_v40  ;;  %244 = vmatprep.subr.mxu1 %v2645_v51  ;;  %3391 = vst [vmem:[#allocation36_spill] sm:$0xff] %v2681_v63  ;;  %3392 = vst [vmem:[#allocation37_spill] sm:$0xff] %v2684_v0 }
  0x4b   :  { %174 = vmatpush1.msra.mxu0 %v2618_v42  ;;  %245 = vmatpush1.msra.mxu1 %v2651_v53 }
  0x4c   :  { %175 = vmatprep.subr.mxu0 %v2624_v44  ;;  %246 = vmatprep.subr.mxu1 %v2657_v55 }
  0x4d   :  { %176 = vmatpush1.msra.mxu0 %v2630_v46  ;;  %247 = vmatpush1.msra.mxu1 %v2663_v57 }
  0x4e   :  { %177 = vmatprep.subr.mxu0 %v2636_v48  ;;  %248 = vmatprep.subr.mxu1 %v2669_v59 }
  0x4f   :  { %178 = vmatpush1.msra.mxu0 %v2642_v50  ;;  %249 = vmatpush1.msra.mxu1 %v2673_v61 }
  0x50   :  { %179 = vmatprep.subr.mxu0 %v2648_v52  ;;  %250 = vmatprep.subr.mxu1 %v2677_v62 }
  0x51   :  { %180 = vmatpush1.msra.mxu0 %v2654_v54  ;;  %v2687_v54 = vld [vmem:[#allocation5 + $0x10] sm:$0xff]  ;;  %251 = vmatpush1.msra.mxu1 %v2681_v63 }
  0x52   :  { %181 = vmatprep.subr.mxu0 %v2660_v56  ;;  %3393 = vst [vmem:[#allocation38_spill] sm:$0xff] %v2687_v54  ;;  %252 = vmatprep.subr.mxu1 %v2684_v0 }
  0x53   :  { %182 = vmatpush1.msra.mxu0 %v2666_v58  ;;  %253 = vmatpush1.msra.mxu1 %v2687_v54 }
  0x54   :  { %216 = vmatmul.mubr.f32.vlgmr.msra.gmra.mxu0 %v77_v60  ;;  %400 = vmatprep.subr.mxu0 %v2500_v1 }
  0x55   :  { %401 = vmatpush1.msra.mxu0 %v2502_v2  ;;  %287 = vmatmul.mubr.f32.vlgmr.msra.gmra.mxu1 %v77_v60  ;;  %v3394_v60 = vld [vmem:[#allocation28_spill] sm:$0xff] }
  0x56   :  { %402 = vmatprep.subr.mxu0 %v2504_v3  ;;  %471 = vmatprep.subr.mxu1 %v2521_v9 }
  0x57   :  { %403 = vmatpush1.msra.mxu0 %v2507_v4  ;;  %472 = vmatpush1.msra.mxu1 %v2527_v11 }
  0x58   :  { %404 = vmatprep.subr.mxu0 %v2510_v5  ;;  %473 = vmatprep.subr.mxu1 %v2533_v13 }
  0x59   :  { %405 = vmatpush1.msra.mxu0 %v2513_v6  ;;  %474 = vmatpush1.msra.mxu1 %v2535_v14 }
  0x5a   :  { %406 = vmatprep.subr.mxu0 %v2516_v7  ;;  %475 = vmatprep.subr.mxu1 %v2541_v16 }
  0x5b   :  { %407 = vmatpush1.msra.mxu0 %v2519_v8  ;;  %476 = vmatpush1.msra.mxu1 %v2547_v18 }
  0x5c   :  { %408 = vmatprep.subr.mxu0 %v2524_v10  ;;  %477 = vmatprep.subr.mxu1 %v2549_v19 }
  0x5d   :  { %409 = vmatpush1.msra.mxu0 %v2530_v12  ;;  %478 = vmatpush1.msra.mxu1 %v2555_v21 }
  0x5e   :  { %410 = vmatprep.subr.mxu0 %v2538_v15  ;;  %479 = vmatprep.subr.mxu1 %v2561_v23 }
  0x5f   :  { %411 = vmatpush1.msra.mxu0 %v2544_v17  ;;  %480 = vmatpush1.msra.mxu1 %v2567_v25 }
  0x60   :  { %412 = vmatprep.subr.mxu0 %v2552_v20  ;;  %481 = vmatprep.subr.mxu1 %v2573_v27 }
  0x61   :  { %413 = vmatpush1.msra.mxu0 %v2558_v22  ;;  %482 = vmatpush1.msra.mxu1 %v2579_v29 }
  0x62   :  { %414 = vmatprep.subr.mxu0 %v2564_v24  ;;  %483 = vmatprep.subr.mxu1 %v2585_v31 }
  0x63   :  { %415 = vmatpush1.msra.mxu0 %v2570_v26  ;;  %484 = vmatpush1.msra.mxu1 %v2591_v33 }
  0x64   :  { %416 = vmatprep.subr.mxu0 %v2576_v28  ;;  %485 = vmatprep.subr.mxu1 %v2597_v35 }
  0x65   :  { %417 = vmatpush1.msra.mxu0 %v2582_v30  ;;  %486 = vmatpush1.msra.mxu1 %v2603_v37 }
  0x66   :  { %418 = vmatprep.subr.mxu0 %v2588_v32  ;;  %487 = vmatprep.subr.mxu1 %v2609_v39 }
  0x67   :  { %419 = vmatpush1.msra.mxu0 %v2594_v34  ;;  %488 = vmatpush1.msra.mxu1 %v2615_v41 }
  0x68   :  { %420 = vmatprep.subr.mxu0 %v2600_v36  ;;  %489 = vmatprep.subr.mxu1 %v2621_v43 }
  0x69   :  { %421 = vmatpush1.msra.mxu0 %v2606_v38  ;;  %490 = vmatpush1.msra.mxu1 %v2627_v45 }
  0x6a   :  { %422 = vmatprep.subr.mxu0 %v2612_v40  ;;  %491 = vmatprep.subr.mxu1 %v2633_v47 }
  0x6b   :  { %423 = vmatpush1.msra.mxu0 %v2618_v42  ;;  %492 = vmatpush1.msra.mxu1 %v2639_v49 }
  0x6c   :  { %424 = vmatprep.subr.mxu0 %v2624_v44  ;;  %493 = vmatprep.subr.mxu1 %v2645_v51 }
  0x6d   :  { %425 = vmatpush1.msra.mxu0 %v2630_v46  ;;  %494 = vmatpush1.msra.mxu1 %v2651_v53 }
  0x6e   :  { %426 = vmatprep.subr.mxu0 %v2636_v48  ;;  %495 = vmatprep.subr.mxu1 %v2657_v55  ;;  %v3395_v48 = vmov 0.0  }
  0x6f   :  { %427 = vmatpush1.msra.mxu0 %v2642_v50  ;;  %496 = vmatpush1.msra.mxu1 %v2663_v57 }
  0x70   :  { %428 = vmatprep.subr.mxu0 %v2648_v52  ;;  %497 = vmatprep.subr.mxu1 %v2669_v59  ;;  %v84_v52 = vld [vmem:[#allocation2 + $0x8] sm:$0xff] }
  0x71   :  { %429 = vmatpush1.msra.mxu0 %v3394_v60  ;;  %498 = vmatpush1.msra.mxu1 %v2673_v61  ;;  %v83_v60 = vld [vmem:[#allocation2] sm:$0xff] }
  0x72   :  { %430 = vmatprep.subr.mxu0 %v2660_v56  ;;  %499 = vmatprep.subr.mxu1 %v2677_v62 }
  0x73   :  { %431 = vmatpush1.msra.mxu0 %v2666_v58  ;;  %500 = vmatpush1.msra.mxu1 %v2681_v63 }
  0x74   :  { %464 = vmatprep.mubr.f32.mxu0 %v3395_v48  ;;  %501 = vmatprep.subr.mxu1 %v2684_v0  ;;  %v86_v0 = vld [vmem:[#allocation2 + $0x18] sm:$0xff] }
  0x75   :  { %535 = vmatprep.mubr.f32.mxu1 %v3395_v48  ;;  %502 = vmatpush1.msra.mxu1 %v2687_v54  ;;  %v85_v48 = vld [vmem:[#allocation2 + $0x10] sm:$0xff] }
  0x76   :  { %650 = vmatprep.subr.mxu0 %v2500_v1  ;;  %721 = vmatprep.subr.mxu1 %v2521_v9 }
 0x114   :  { %v217_v56 = vpop.f32.mrf.mxu0 }
 0x115   :  { %v293_v62 = vadd.f32 %v217_v56, %v83_v60  ;;  %v288_v59 = vpop.f32.mrf.mxu1 }
 0x116   :  { %v219_v61 = vpop.f32.mrf.mxu0  ;;  %v295_v54 = vadd.f32 %v288_v59, %v85_v48  ;;  %v332_v48 = vld [vmem:[#allocation2 + $0x20] sm:$0xff] }
 0x117   :  { %v2125_v58 = vmul.f32 -1.442695, %v293_v62  ;;  %v294_v50 = vadd.f32 %v219_v61, %v84_v52  ;;  %v290_v57 = vpop.f32.mrf.mxu1 }
 0x118   :  { %v296_v46 = vadd.f32 %v290_v57, %v86_v0 }
 0x119   :  { %2161 = vpow2.f32 %v2125_v58  ;;  %v2126_v63 = vmul.f32 -1.442695, %v294_v50  ;;  %v79_v50 = vld [vmem:[#allocation8] sm:$0xff] }
 0x11a   :  { %v2127_v55 = vmul.f32 -1.442695, %v296_v46 }
 0x11b   :  { %2163 = vpow2.f32 %v2126_v63 }
 0x11c   :  { %2165 = vtanh.f32 %v295_v54  ;;  %v333_v54 = vld [vmem:[#allocation2 + $0x28] sm:$0xff] }
 0x11d   :  { %2167 = vpow2.f32 %v2127_v55 }
 0x126   :  { %v2162_v1 = vpop.eup %2161 }
 0x127   :  { %v300_v44 = vadd.f32 1.0, %v2162_v1 }
 0x128   :  { %v2164_v9 = vpop.eup %2163 }
 0x129   :  { %2169 = vrcp.f32 %v300_v44  ;;  %v306_v56 = vadd.f32 1.0, %v2164_v9  ;;  %v2166_v62 = vpop.eup %2165  ;;  %v3400_v9 = vld [vmem:[#allocation23_spill] sm:$0xff]  ;;  %v3416_v44 = vld [vmem:[#allocation20_spill] sm:$0xff] }
 0x12a   :  { %v2168_v52 = vpop.eup %2167 }
 0x12b   :  { %2171 = vrcp.f32 %v306_v56  ;;  %v313_v63 = vadd.f32 1.0, %v2168_v52 }
 0x12d   :  { %2173 = vrcp.f32 %v313_v63  ;;  %v334_v63 = vld [vmem:[#allocation2 + $0x30] sm:$0xff] }
 0x136   :  { %v2170_v58 = vpop.eup %2169 }
 0x137   :  { %v317_v53 = vmul.f32 %v2170_v58, %v2166_v62  ;;  %v335_v58 = vld [vmem:[#allocation2 + $0x38] sm:$0xff] }
 0x138   :  { %v2172_v61 = vpop.eup %2171 }
 0x139   :  { %v316_v60 = vmul.f32 %v2172_v61, %v79_v50 }
 0x13a   :  { %v2174_v0 = vpop.eup %2173 }
 0x13b   :  { %v2760_v42 = vadd.f32 %v317_v53, %v316_v60 }
 0x13d   :  { %2175 = vtanh.f32 %v2760_v42 }
 0x14a   :  { %v2176_v1 = vpop.eup %2175 }
 0x14b   :  { %v320_v46 = vmul.f32 %v2176_v1, %v2174_v0 }
 0x14d   :  { %321 = vst [vmem:[#allocation10] sm:$0xff] %v320_v46  ;;  %465 = vmatmul.mubr.f32.vlgmr.msra.gmra.mxu0 %v320_v46  ;;  %536 = vmatmul.mubr.f32.vlgmr.msra.gmra.mxu1 %v320_v46 }
 0x14e   :  { %651 = vmatpush1.msra.mxu0 %v2502_v2  ;;  %722 = vmatpush1.msra.mxu1 %v2527_v11 }
 0x14f   :  { %652 = vmatprep.subr.mxu0 %v2504_v3  ;;  %723 = vmatprep.subr.mxu1 %v2533_v13 }
 0x150   :  { %653 = vmatpush1.msra.mxu0 %v2507_v4  ;;  %724 = vmatpush1.msra.mxu1 %v2535_v14 }
 0x151   :  { %654 = vmatprep.subr.mxu0 %v2510_v5  ;;  %725 = vmatprep.subr.mxu1 %v2541_v16  ;;  %v3396_v5 = vld [vmem:[#allocation21_spill] sm:$0xff] }
 0x152   :  { %655 = vmatpush1.msra.mxu0 %v2513_v6  ;;  %726 = vmatpush1.msra.mxu1 %v2547_v18  ;;  %v3397_v6 = vld [vmem:[#allocation27_spill] sm:$0xff] }
 0x153   :  { %656 = vmatprep.subr.mxu0 %v2516_v7  ;;  %727 = vmatprep.subr.mxu1 %v2549_v19  ;;  %v3398_v7 = vld [vmem:[#allocation22_spill] sm:$0xff] }
 0x154   :  { %657 = vmatpush1.msra.mxu0 %v2519_v8  ;;  %728 = vmatpush1.msra.mxu1 %v2555_v21  ;;  %v3399_v8 = vld [vmem:[#allocation29_spill] sm:$0xff] }
 0x155   :  { %658 = vmatprep.subr.mxu0 %v2524_v10  ;;  %729 = vmatprep.subr.mxu1 %v2561_v23  ;;  %v3401_v10 = vld [vmem:[#allocation31_spill] sm:$0xff] }
 0x156   :  { %659 = vmatpush1.msra.mxu0 %v2530_v12  ;;  %730 = vmatpush1.msra.mxu1 %v2567_v25  ;;  %v3402_v12 = vld [vmem:[#allocation24_spill] sm:$0xff] }
 0x157   :  { %660 = vmatprep.subr.mxu0 %v2538_v15  ;;  %731 = vmatprep.subr.mxu1 %v2573_v27  ;;  %v3403_v15 = vld [vmem:[#allocation33_spill] sm:$0xff] }
 0x158   :  { %661 = vmatpush1.msra.mxu0 %v2544_v17  ;;  %732 = vmatpush1.msra.mxu1 %v2579_v29  ;;  %v3404_v17 = vld [vmem:[#allocation25_spill] sm:$0xff] }
 0x159   :  { %662 = vmatprep.subr.mxu0 %v2552_v20  ;;  %733 = vmatprep.subr.mxu1 %v2585_v31  ;;  %v3405_v20 = vld [vmem:[#allocation34_spill] sm:$0xff] }
 0x15a   :  { %663 = vmatpush1.msra.mxu0 %v2558_v22  ;;  %734 = vmatpush1.msra.mxu1 %v2591_v33  ;;  %v3406_v22 = vld [vmem:[#allocation26_spill] sm:$0xff] }
 0x15b   :  { %664 = vmatprep.subr.mxu0 %v2564_v24  ;;  %735 = vmatprep.subr.mxu1 %v2597_v35  ;;  %v3407_v24 = vld [vmem:[#allocation35_spill] sm:$0xff] }
 0x15c   :  { %665 = vmatpush1.msra.mxu0 %v2570_v26  ;;  %736 = vmatpush1.msra.mxu1 %v2603_v37  ;;  %v3408_v26 = vld [vmem:[#allocation28_spill] sm:$0xff] }
 0x15d   :  { %666 = vmatprep.subr.mxu0 %v2576_v28  ;;  %737 = vmatprep.subr.mxu1 %v2609_v39  ;;  %v3409_v28 = vld [vmem:[#allocation36_spill] sm:$0xff] }
 0x15e   :  { %667 = vmatpush1.msra.mxu0 %v2582_v30  ;;  %738 = vmatpush1.msra.mxu1 %v2615_v41  ;;  %v3410_v30 = vld [vmem:[#allocation30_spill] sm:$0xff] }
 0x15f   :  { %668 = vmatprep.subr.mxu0 %v2588_v32  ;;  %739 = vmatprep.subr.mxu1 %v2621_v43  ;;  %v3411_v32 = vld [vmem:[#allocation37_spill] sm:$0xff] }
 0x160   :  { %669 = vmatpush1.msra.mxu0 %v2594_v34  ;;  %740 = vmatpush1.msra.mxu1 %v2627_v45  ;;  %v3412_v34 = vld [vmem:[#allocation32_spill] sm:$0xff] }
 0x161   :  { %670 = vmatprep.subr.mxu0 %v2600_v36  ;;  %741 = vmatprep.subr.mxu1 %v2633_v47  ;;  %v3413_v36 = vmov 0.0  }
 0x162   :  { %671 = vmatpush1.msra.mxu0 %v2606_v38  ;;  %742 = vmatpush1.msra.mxu1 %v2639_v49  ;;  %v3414_v38 = vld [vmem:[#allocation38_spill] sm:$0xff] }
 0x163   :  { %672 = vmatprep.subr.mxu0 %v2612_v40  ;;  %743 = vmatprep.subr.mxu1 %v2645_v51  ;;  %v3415_v40 = vld [vmem:[#allocation19_spill] sm:$0xff] }
 0x164   :  { %673 = vmatpush1.msra.mxu0 %v3396_v5  ;;  %744 = vmatpush1.msra.mxu1 %v3397_v6 }
 0x165   :  { %674 = vmatprep.subr.mxu0 %v3398_v7  ;;  %745 = vmatprep.subr.mxu1 %v3399_v8 }
 0x166   :  { %675 = vmatpush1.msra.mxu0 %v3400_v9  ;;  %746 = vmatpush1.msra.mxu1 %v3401_v10 }
 0x167   :  { %676 = vmatprep.subr.mxu0 %v3402_v12  ;;  %747 = vmatprep.subr.mxu1 %v3403_v15 }
 0x168   :  { %677 = vmatpush1.msra.mxu0 %v3404_v17  ;;  %748 = vmatpush1.msra.mxu1 %v3405_v20 }
 0x169   :  { %678 = vmatprep.subr.mxu0 %v3406_v22  ;;  %749 = vmatprep.subr.mxu1 %v3407_v24 }
 0x16a   :  { %679 = vmatpush1.msra.mxu0 %v3408_v26  ;;  %750 = vmatpush1.msra.mxu1 %v3409_v28 }
 0x16b   :  { %680 = vmatprep.subr.mxu0 %v3410_v30  ;;  %751 = vmatprep.subr.mxu1 %v3411_v32 }
 0x16c   :  { %681 = vmatpush1.msra.mxu0 %v3412_v34  ;;  %714 = vmatprep.mubr.f32.mxu0 %v3413_v36 }
 0x16d   :  { %752 = vmatpush1.msra.mxu1 %v3414_v38  ;;  %785 = vmatprep.mubr.f32.mxu1 %v3413_v36 }
 0x16e   :  { %900 = vmatprep.subr.mxu0 %v3415_v40  ;;  %971 = vmatprep.subr.mxu1 %v3416_v44 }
 0x20d   :  { %v466_v53 = vpop.f32.mrf.mxu0  ;;  %v537_v62 = vpop.f32.mrf.mxu1 }
 0x20e   :  { %v542_v55 = vadd.f32 %v466_v53, %v332_v48  ;;  %v544_v1 = vadd.f32 %v537_v62, %v334_v63  ;;  %v584_v62 = vld [vmem:[#allocation2 + $0x50] sm:$0xff] }
 0x20f   :  { %v468_v57 = vpop.f32.mrf.mxu0  ;;  %v539_v50 = vpop.f32.mrf.mxu1 }
 0x210   :  { %v2128_v59 = vmul.f32 -1.442695, %v542_v55  ;;  %v543_v56 = vadd.f32 %v468_v57, %v333_v54  ;;  %v545_v61 = vadd.f32 %v539_v50, %v335_v58  ;;  %v585_v57 = vld [vmem:[#allocation2 + $0x58] sm:$0xff] }
 0x212   :  { %2177 = vpow2.f32 %v2128_v59  ;;  %v2129_v52 = vmul.f32 -1.442695, %v543_v56  ;;  %v2130_v60 = vmul.f32 -1.442695, %v545_v61 }
 0x214   :  { %2179 = vpow2.f32 %v2129_v52 }
 0x215   :  { %2181 = vpow2.f32 %v2130_v60 }
 0x21f   :  { %v2178_v0 = vpop.eup %2177 }
 0x220   :  { %v549_v46 = vadd.f32 1.0, %v2178_v0 }
 0x221   :  { %v2180_v5 = vpop.eup %2179 }
 0x222   :  { %2183 = vrcp.f32 %v549_v46  ;;  %v555_v7 = vadd.f32 1.0, %v2180_v5  ;;  %v2182_v9 = vpop.eup %2181 }
 0x223   :  { %2185 = vtanh.f32 %v544_v1  ;;  %v562_v26 = vadd.f32 1.0, %v2182_v9 }
 0x224   :  { %2187 = vrcp.f32 %v555_v7 }
 0x225   :  { %2189 = vrcp.f32 %v562_v26 }
 0x22f   :  { %v2184_v12 = vpop.eup %2183 }
 0x230   :  { %v2186_v17 = vpop.eup %2185 }
 0x231   :  { %v2188_v22 = vpop.eup %2187  ;;  %v566_v30 = vmul.f32 %v2186_v17, %v2184_v12 }
 0x232   :  { %v565_v34 = vmul.f32 %v2188_v22, %v2760_v42  ;;  %v2190_v44 = vpop.eup %2189  ;;  %v2929_v42 = vld [vmem:[#allocation5 + $0x68] sm:$0xff] }
 0x233   :  { %3418 = vst [vmem:[#allocation27_spill] sm:$0xff] %v2929_v42 }
 0x234   :  { %v2830_v40 = vadd.f32 %v566_v30, %v565_v34  ;;  %v2959_v34 = vld [vmem:[#allocation5 + $0x1e8] sm:$0xff] }
 0x235   :  { %3426 = vst [vmem:[#allocation34_spill] sm:$0xff] %v2959_v34 }
 0x236   :  { %2191 = vtanh.f32 %v2830_v40 }
 0x243   :  { %v2192_v48 = vpop.eup %2191 }
 0x244   :  { %v569_v53 = vmul.f32 %v2192_v48, %v2190_v44  ;;  %v2961_v44 = vld [vmem:[#allocation5 + $0x1f8] sm:$0xff]  ;;  %v2967_v48 = vld [vmem:[#allocation5 + $0x1f0] sm:$0xff] }
 0x245   :  { %3427 = vst [vmem:[#allocation26_spill] sm:$0xff] %v2961_v44 }
 0x246   :  { %571 = vst [vmem:[#allocation10 + $0x8] sm:$0xff] %v569_v53  ;;  %715 = vmatmul.mubr.f32.vlgmr.msra.gmra.mxu0 %v569_v53  ;;  %786 = vmatmul.mubr.f32.vlgmr.msra.gmra.mxu1 %v569_v53  ;;  %v2971_v53 = vld [vmem:[#allocation5 + $0x1c8] sm:$0xff] }
 0x247   :  { %901 = vmatpush1.msra.mxu0 %v2502_v2  ;;  %972 = vmatpush1.msra.mxu1 %v2527_v11  ;;  %v2869_v2 = vld [vmem:[#allocation5 + $0x1a8] sm:$0xff]  ;;  %v2878_v11 = vld [vmem:[#allocation5 + $0x180] sm:$0xff] }
 0x248   :  { %902 = vmatprep.subr.mxu0 %v2504_v3  ;;  %973 = vmatprep.subr.mxu1 %v2533_v13  ;;  %v2872_v3 = vld [vmem:[#allocation5 + $0x1a0] sm:$0xff]  ;;  %v2881_v13 = vld [vmem:[#allocation5 + $0x168] sm:$0xff] }
 0x249   :  { %903 = vmatpush1.msra.mxu0 %v2507_v4  ;;  %974 = vmatpush1.msra.mxu1 %v2535_v14  ;;  %v2875_v4 = vld [vmem:[#allocation5 + $0x188] sm:$0xff]  ;;  %v2884_v14 = vld [vmem:[#allocation5 + $0x160] sm:$0xff] }
 0x24a   :  { %975 = vmatprep.subr.mxu1 %v2541_v16  ;;  %964 = vmatprep.mubr.f32.mxu0 %v3413_v36  ;;  %v2887_v16 = vld [vmem:[#allocation5 + $0x148] sm:$0xff] }
 0x24b   :  { %976 = vmatpush1.msra.mxu1 %v2547_v18  ;;  %1035 = vmatprep.mubr.f32.mxu1 %v3413_v36  ;;  %v2890_v18 = vld [vmem:[#allocation5 + $0x140] sm:$0xff] }
 0x24c   :  { %977 = vmatprep.subr.mxu1 %v2549_v19  ;;  %904 = vmatprep.subr.mxu0 %v2869_v2  ;;  %v2893_v19 = vld [vmem:[#allocation5 + $0x128] sm:$0xff] }
 0x24d   :  { %978 = vmatpush1.msra.mxu1 %v2555_v21  ;;  %905 = vmatpush1.msra.mxu0 %v2872_v3  ;;  %v2896_v21 = vld [vmem:[#allocation5 + $0x120] sm:$0xff] }
 0x24e   :  { %979 = vmatprep.subr.mxu1 %v2561_v23  ;;  %906 = vmatprep.subr.mxu0 %v2875_v4  ;;  %v2899_v23 = vld [vmem:[#allocation5 + $0x108] sm:$0xff] }
 0x24f   :  { %980 = vmatpush1.msra.mxu1 %v2567_v25  ;;  %907 = vmatpush1.msra.mxu0 %v2878_v11  ;;  %v2902_v25 = vld [vmem:[#allocation5 + $0x100] sm:$0xff] }
 0x250   :  { %981 = vmatprep.subr.mxu1 %v2573_v27  ;;  %908 = vmatprep.subr.mxu0 %v2881_v13  ;;  %v2905_v27 = vld [vmem:[#allocation5 + $0xe8] sm:$0xff] }
 0x251   :  { %982 = vmatpush1.msra.mxu1 %v2579_v29  ;;  %909 = vmatpush1.msra.mxu0 %v2884_v14  ;;  %v2908_v29 = vld [vmem:[#allocation5 + $0xe0] sm:$0xff] }
 0x252   :  { %983 = vmatprep.subr.mxu1 %v2585_v31  ;;  %910 = vmatprep.subr.mxu0 %v2887_v16  ;;  %v2911_v31 = vld [vmem:[#allocation5 + $0xc8] sm:$0xff] }
 0x253   :  { %984 = vmatpush1.msra.mxu1 %v2591_v33  ;;  %911 = vmatpush1.msra.mxu0 %v2890_v18  ;;  %v2914_v33 = vld [vmem:[#allocation5 + $0xc0] sm:$0xff] }
 0x254   :  { %985 = vmatprep.subr.mxu1 %v2597_v35  ;;  %912 = vmatprep.subr.mxu0 %v2893_v19  ;;  %v2917_v35 = vld [vmem:[#allocation5 + $0xa8] sm:$0xff] }
 0x255   :  { %986 = vmatpush1.msra.mxu1 %v2603_v37  ;;  %913 = vmatpush1.msra.mxu0 %v2896_v21  ;;  %v2920_v37 = vld [vmem:[#allocation5 + $0xa0] sm:$0xff] }
 0x256   :  { %987 = vmatprep.subr.mxu1 %v2609_v39  ;;  %914 = vmatprep.subr.mxu0 %v2899_v23  ;;  %v2923_v39 = vld [vmem:[#allocation5 + $0x88] sm:$0xff] }
 0x257   :  { %988 = vmatpush1.msra.mxu1 %v2615_v41  ;;  %915 = vmatpush1.msra.mxu0 %v2902_v25  ;;  %v2926_v41 = vld [vmem:[#allocation5 + $0x80] sm:$0xff] }
 0x258   :  { %989 = vmatprep.subr.mxu1 %v2621_v43  ;;  %916 = vmatprep.subr.mxu0 %v2905_v27  ;;  %3417 = vst [vmem:[#allocation21_spill] sm:$0xff] %v2926_v41  ;;  %v2932_v43 = vld [vmem:[#allocation5 + $0x60] sm:$0xff] }
 0x259   :  { %990 = vmatpush1.msra.mxu1 %v2627_v45  ;;  %917 = vmatpush1.msra.mxu0 %v2908_v29  ;;  %3419 = vst [vmem:[#allocation22_spill] sm:$0xff] %v2932_v43  ;;  %v2935_v45 = vld [vmem:[#allocation5 + $0x48] sm:$0xff] }
 0x25a   :  { %991 = vmatprep.subr.mxu1 %v2633_v47  ;;  %918 = vmatprep.subr.mxu0 %v2911_v31  ;;  %3420 = vst [vmem:[#allocation29_spill] sm:$0xff] %v2935_v45  ;;  %v2938_v47 = vld [vmem:[#allocation5 + $0x40] sm:$0xff] }
 0x25b   :  { %992 = vmatpush1.msra.mxu1 %v2639_v49  ;;  %919 = vmatpush1.msra.mxu0 %v2914_v33  ;;  %3421 = vst [vmem:[#allocation23_spill] sm:$0xff] %v2938_v47  ;;  %v2941_v49 = vld [vmem:[#allocation5 + $0x28] sm:$0xff] }
 0x25c   :  { %993 = vmatprep.subr.mxu1 %v2645_v51  ;;  %920 = vmatprep.subr.mxu0 %v2917_v35  ;;  %3422 = vst [vmem:[#allocation31_spill] sm:$0xff] %v2941_v49  ;;  %v2944_v51 = vld [vmem:[#allocation5 + $0x20] sm:$0xff] }
 0x25d   :  { %994 = vmatpush1.msra.mxu1 %v3397_v6  ;;  %921 = vmatpush1.msra.mxu0 %v2920_v37  ;;  %3423 = vst [vmem:[#allocation24_spill] sm:$0xff] %v2944_v51  ;;  %v2947_v6 = vld [vmem:[#allocation5 + $0x8] sm:$0xff] }
 0x25e   :  { %995 = vmatprep.subr.mxu1 %v3399_v8  ;;  %922 = vmatprep.subr.mxu0 %v2923_v39  ;;  %3424 = vst [vmem:[#allocation33_spill] sm:$0xff] %v2947_v6  ;;  %v2950_v8 = vld [vmem:[#allocation5] sm:$0xff] }
 0x25f   :  { %996 = vmatpush1.msra.mxu1 %v3401_v10  ;;  %923 = vmatpush1.msra.mxu0 %v2926_v41  ;;  %3425 = vst [vmem:[#allocation25_spill] sm:$0xff] %v2950_v8  ;;  %v582_v10 = vld [vmem:[#allocation2 + $0x40] sm:$0xff] }
 0x260   :  { %997 = vmatprep.subr.mxu1 %v3403_v15  ;;  %924 = vmatprep.subr.mxu0 %v2929_v42 }
 0x261   :  { %998 = vmatpush1.msra.mxu1 %v3405_v20  ;;  %925 = vmatpush1.msra.mxu0 %v2932_v43  ;;  %v583_v20 = vld [vmem:[#allocation2 + $0x48] sm:$0xff] }
 0x262   :  { %999 = vmatprep.subr.mxu1 %v3407_v24  ;;  %926 = vmatprep.subr.mxu0 %v2935_v45 }
 0x263   :  { %1000 = vmatpush1.msra.mxu1 %v3409_v28  ;;  %927 = vmatpush1.msra.mxu0 %v2938_v47 }
 0x264   :  { %1001 = vmatprep.subr.mxu1 %v3411_v32  ;;  %928 = vmatprep.subr.mxu0 %v2941_v49 }
 0x265   :  { %1002 = vmatpush1.msra.mxu1 %v3414_v38  ;;  %929 = vmatpush1.msra.mxu0 %v2944_v51 }
 0x266   :  { %930 = vmatprep.subr.mxu0 %v2947_v6  ;;  %1221 = vmatprep.subr.mxu1 %v2961_v44 }
 0x267   :  { %931 = vmatpush1.msra.mxu0 %v2950_v8 }
 0x268   :  { %1150 = vmatprep.subr.mxu0 %v2959_v34 }
 0x306   :  { %v716_v15 = vpop.f32.mrf.mxu0  ;;  %v787_v54 = vpop.f32.mrf.mxu1 }
 0x307   :  { %v792_v24 = vadd.f32 %v716_v15, %v582_v10  ;;  %v794_v50 = vadd.f32 %v787_v54, %v584_v62  ;;  %v2973_v10 = vld [vmem:[#allocation5 + $0x1d8] sm:$0xff]  ;;  %v2977_v15 = vld [vmem:[#allocation5 + $0x1c0] sm:$0xff]  ;;  %v3019_v62 = vld [vmem:[#allocation5 + $0x130] sm:$0xff] }
 0x308   :  { %v718_v28 = vpop.f32.mrf.mxu0  ;;  %v789_v59 = vpop.f32.mrf.mxu1  ;;  %v2999_v54 = vld [vmem:[#allocation5 + $0x178] sm:$0xff] }
 0x309   :  { %v2131_v32 = vmul.f32 -1.442695, %v792_v24  ;;  %v793_v38 = vadd.f32 %v718_v28, %v583_v20  ;;  %v795_v56 = vadd.f32 %v789_v59, %v585_v57  ;;  %v2979_v20 = vld [vmem:[#allocation5 + $0x1d0] sm:$0xff]  ;;  %v2983_v24 = vld [vmem:[#allocation5 + $0x1b8] sm:$0xff] }
 0x30a   :  { %v2987_v28 = vld [vmem:[#allocation5 + $0x1b0] sm:$0xff]  ;;  %v3007_v57 = vld [vmem:[#allocation5 + $0x158] sm:$0xff] }
 0x30b   :  { %2193 = vpow2.f32 %v2131_v32  ;;  %v2132_v55 = vmul.f32 -1.442695, %v793_v38  ;;  %v2133_v52 = vmul.f32 -1.442695, %v795_v56  ;;  %v2991_v32 = vld [vmem:[#allocation5 + $0x198] sm:$0xff]  ;;  %v2995_v38 = vld [vmem:[#allocation5 + $0x190] sm:$0xff] }
 0x30c   :  { %v3011_v59 = vld [vmem:[#allocation5 + $0x150] sm:$0xff]  ;;  %v3015_v56 = vld [vmem:[#allocation5 + $0x138] sm:$0xff] }
 0x30d   :  { %2195 = vpow2.f32 %v2132_v55  ;;  %v3003_v55 = vld [vmem:[#allocation5 + $0x170] sm:$0xff] }
 0x30e   :  { %2197 = vpow2.f32 %v2133_v52  ;;  %v3023_v52 = vld [vmem:[#allocation5 + $0x118] sm:$0xff] }
 0x318   :  { %v2194_v58 = vpop.eup %2193 }
 0x319   :  { %v799_v61 = vadd.f32 1.0, %v2194_v58  ;;  %v3027_v58 = vld [vmem:[#allocation5 + $0x110] sm:$0xff] }
 0x31a   :  { %v2196_v63 = vpop.eup %2195 }
 0x31b   :  { %2199 = vrcp.f32 %v799_v61  ;;  %v805_v60 = vadd.f32 1.0, %v2196_v63  ;;  %v2198_v0 = vpop.eup %2197  ;;  %v3035_v61 = vld [vmem:[#allocation5 + $0xf0] sm:$0xff]  ;;  %v3039_v63 = vld [vmem:[#allocation5 + $0xd8] sm:$0xff] }
 0x31c   :  { %2201 = vtanh.f32 %v794_v50  ;;  %v812_v7 = vadd.f32 1.0, %v2198_v0  ;;  %v3031_v50 = vld [vmem:[#allocation5 + $0xf8] sm:$0xff] }
 0x31d   :  { %2203 = vrcp.f32 %v805_v60  ;;  %v3043_v60 = vld [vmem:[#allocation5 + $0xd0] sm:$0xff]  ;;  %v3047_v0 = vld [vmem:[#allocation5 + $0xb8] sm:$0xff] }
 0x31e   :  { %2205 = vrcp.f32 %v812_v7  ;;  %v3063_v7 = vld [vmem:[#allocation5 + $0x78] sm:$0xff] }
 0x31f   :  { %3429 = vst [vmem:[#allocation28_spill] sm:$0xff] %v3063_v7 }
 0x328   :  { %v2200_v1 = vpop.eup %2199 }
 0x329   :  { %v2202_v46 = vpop.eup %2201 }
 0x32a   :  { %v2204_v5 = vpop.eup %2203  ;;  %v816_v9 = vmul.f32 %v2202_v46, %v2200_v1  ;;  %v3051_v1 = vld [vmem:[#allocation5 + $0xb0] sm:$0xff]  ;;  %v3055_v46 = vld [vmem:[#allocation5 + $0x98] sm:$0xff] }
 0x32b   :  { %v815_v12 = vmul.f32 %v2204_v5, %v2830_v40  ;;  %v2206_v22 = vpop.eup %2205  ;;  %v2965_v40 = vld [vmem:[#allocation5 + $0x1e0] sm:$0xff]  ;;  %v3059_v5 = vld [vmem:[#allocation5 + $0x90] sm:$0xff] }
 0x32c   :  { %3428 = vst [vmem:[#allocation35_spill] sm:$0xff] %v3059_v5 }
 0x32d   :  { %v2954_v17 = vadd.f32 %v816_v9, %v815_v12  ;;  %v3067_v9 = vld [vmem:[#allocation5 + $0x70] sm:$0xff]  ;;  %v3071_v12 = vld [vmem:[#allocation5 + $0x58] sm:$0xff] }
 0x32e   :  { %3430 = vst [vmem:[#allocation36_spill] sm:$0xff] %v3067_v9  ;;  %3431 = vst [vmem:[#allocation30_spill] sm:$0xff] %v3071_v12 }
 0x32f   :  { %2207 = vtanh.f32 %v2954_v17 }
 0x33c   :  { %v2208_v26 = vpop.eup %2207 }
 0x33d   :  { %v819_v30 = vmul.f32 %v2208_v26, %v2206_v22  ;;  %v3075_v22 = vld [vmem:[#allocation5 + $0x50] sm:$0xff]  ;;  %v3079_v26 = vld [vmem:[#allocation5 + $0x38] sm:$0xff] }
 0x33e   :  { %3432 = vst [vmem:[#allocation37_spill] sm:$0xff] %v3075_v22  ;;  %3433 = vst [vmem:[#allocation32_spill] sm:$0xff] %v3079_v26 }
 0x33f   :  { %821 = vst [vmem:[#allocation10 + $0x10] sm:$0xff] %v819_v30  ;;  %965 = vmatmul.mubr.f32.vlgmr.msra.gmra.mxu0 %v819_v30  ;;  %1036 = vmatmul.mubr.f32.vlgmr.msra.gmra.mxu1 %v819_v30  ;;  %v3083_v30 = vld [vmem:[#allocation5 + $0x30] sm:$0xff] }
 0x340   :  { %1214 = vmatprep.mubr.f32.mxu0 %v3413_v36  ;;  %1285 = vmatprep.mubr.f32.mxu1 %v3413_v36  ;;  %3434 = vst [vmem:[#allocation38_spill] sm:$0xff] %v3083_v30  ;;  %v3087_v36 = vld [vmem:[#allocation5 + $0x18] sm:$0xff] }
 0x341   :  { %1151 = vmatpush1.msra.mxu0 %v2965_v40  ;;  %1222 = vmatpush1.msra.mxu1 %v2967_v48  ;;  %3435 = vst [vmem:[#allocation19_spill] sm:$0xff] %v3087_v36 }
 0x342   :  { %1152 = vmatprep.subr.mxu0 %v2971_v53  ;;  %1223 = vmatprep.subr.mxu1 %v2973_v10 }
 0x343   :  { %1153 = vmatpush1.msra.mxu0 %v2977_v15  ;;  %1224 = vmatpush1.msra.mxu1 %v2979_v20 }
 0x344   :  { %1154 = vmatprep.subr.mxu0 %v2869_v2  ;;  %1225 = vmatprep.subr.mxu1 %v2983_v24 }
 0x345   :  { %1155 = vmatpush1.msra.mxu0 %v2872_v3  ;;  %1226 = vmatpush1.msra.mxu1 %v2987_v28 }
 0x346   :  { %1156 = vmatprep.subr.mxu0 %v2875_v4  ;;  %1227 = vmatprep.subr.mxu1 %v2991_v32 }
 0x347   :  { %1157 = vmatpush1.msra.mxu0 %v2878_v11  ;;  %1228 = vmatpush1.msra.mxu1 %v2995_v38 }
 0x348   :  { %1158 = vmatprep.subr.mxu0 %v2881_v13  ;;  %1229 = vmatprep.subr.mxu1 %v2999_v54 }
 0x349   :  { %1159 = vmatpush1.msra.mxu0 %v2884_v14  ;;  %1230 = vmatpush1.msra.mxu1 %v3003_v55 }
 0x34a   :  { %1160 = vmatprep.subr.mxu0 %v2887_v16  ;;  %1231 = vmatprep.subr.mxu1 %v3007_v57 }
 0x34b   :  { %1161 = vmatpush1.msra.mxu0 %v2890_v18  ;;  %1232 = vmatpush1.msra.mxu1 %v3011_v59 }
 0x34c   :  { %1162 = vmatprep.subr.mxu0 %v2893_v19  ;;  %1233 = vmatprep.subr.mxu1 %v3015_v56 }
 0x34d   :  { %1163 = vmatpush1.msra.mxu0 %v2896_v21  ;;  %1234 = vmatpush1.msra.mxu1 %v3019_v62 }
 0x34e   :  { %1164 = vmatprep.subr.mxu0 %v2899_v23  ;;  %1235 = vmatprep.subr.mxu1 %v3023_v52 }
 0x34f   :  { %1165 = vmatpush1.msra.mxu0 %v2902_v25  ;;  %1236 = vmatpush1.msra.mxu1 %v3027_v58 }
 0x350   :  { %1166 = vmatprep.subr.mxu0 %v2905_v27  ;;  %1237 = vmatprep.subr.mxu1 %v3031_v50 }
 0x351   :  { %1167 = vmatpush1.msra.mxu0 %v2908_v29  ;;  %1238 = vmatpush1.msra.mxu1 %v3035_v61 }
 0x352   :  { %1168 = vmatprep.subr.mxu0 %v2911_v31  ;;  %1239 = vmatprep.subr.mxu1 %v3039_v63 }
 0x353   :  { %1169 = vmatpush1.msra.mxu0 %v2914_v33  ;;  %1240 = vmatpush1.msra.mxu1 %v3043_v60 }
 0x354   :  { %1170 = vmatprep.subr.mxu0 %v2917_v35  ;;  %1241 = vmatprep.subr.mxu1 %v3047_v0 }
 0x355   :  { %1171 = vmatpush1.msra.mxu0 %v2920_v37  ;;  %1242 = vmatpush1.msra.mxu1 %v3051_v1 }
 0x356   :  { %1172 = vmatprep.subr.mxu0 %v2923_v39  ;;  %1243 = vmatprep.subr.mxu1 %v3055_v46 }
 0x357   :  { %1173 = vmatpush1.msra.mxu0 %v2926_v41  ;;  %1244 = vmatpush1.msra.mxu1 %v3059_v5 }
 0x358   :  { %1174 = vmatprep.subr.mxu0 %v2929_v42  ;;  %1245 = vmatprep.subr.mxu1 %v3063_v7  ;;  %v834_v7 = vld [vmem:[#allocation2 + $0x70] sm:$0xff] }
 0x359   :  { %1175 = vmatpush1.msra.mxu0 %v2932_v43  ;;  %1246 = vmatpush1.msra.mxu1 %v3067_v9  ;;  %v835_v9 = vld [vmem:[#allocation2 + $0x78] sm:$0xff] }
 0x35a   :  { %1176 = vmatprep.subr.mxu0 %v2935_v45  ;;  %1247 = vmatprep.subr.mxu1 %v3071_v12 }
 0x35b   :  { %1177 = vmatpush1.msra.mxu0 %v2938_v47  ;;  %1248 = vmatpush1.msra.mxu1 %v3075_v22  ;;  %v3091_v47 = vld [vmem:[#allocation5 + $0x10] sm:$0xff] }
 0x35c   :  { %1178 = vmatprep.subr.mxu0 %v2941_v49  ;;  %1249 = vmatprep.subr.mxu1 %v3079_v26  ;;  %3436 = vst [vmem:[#allocation20_spill] sm:$0xff] %v3091_v47  ;;  %v832_v26 = vld [vmem:[#allocation2 + $0x60] sm:$0xff]  ;;  %v833_v49 = vld [vmem:[#allocation2 + $0x68] sm:$0xff] }
 0x35d   :  { %1179 = vmatpush1.msra.mxu0 %v2944_v51  ;;  %1250 = vmatpush1.msra.mxu1 %v3083_v30 }
 0x35e   :  { %1180 = vmatprep.subr.mxu0 %v2947_v6  ;;  %1251 = vmatprep.subr.mxu1 %v3087_v36 }
 0x35f   :  { %1181 = vmatpush1.msra.mxu0 %v2950_v8  ;;  %1252 = vmatpush1.msra.mxu1 %v3091_v47 }
 0x360   :  { %1400 = vmatprep.subr.mxu0 %v2959_v34  ;;  %1471 = vmatprep.subr.mxu1 %v2961_v44 }
 0x3ff   :  { %v966_v51 = vpop.f32.mrf.mxu0  ;;  %v1037_v6 = vpop.f32.mrf.mxu1 }
 0x400   :  { %v1042_v30 = vadd.f32 %v966_v51, %v832_v26  ;;  %v1044_v34 = vadd.f32 %v1037_v6, %v834_v7  ;;  %v3443_v7 = vld [vmem:[#allocation29_spill] sm:$0xff] }
 0x401   :  { %v968_v22 = vpop.f32.mrf.mxu0  ;;  %v1039_v43 = vpop.f32.mrf.mxu1 }
 0x402   :  { %v2134_v12 = vmul.f32 -1.442695, %v1042_v30  ;;  %v1043_v45 = vadd.f32 %v968_v22, %v833_v49  ;;  %v1045_v8 = vadd.f32 %v1039_v43, %v835_v9  ;;  %v3444_v9 = vld [vmem:[#allocation30_spill] sm:$0xff]  ;;  %v3445_v30 = vld [vmem:[#allocation23_spill] sm:$0xff] }
 0x404   :  { %2209 = vpow2.f32 %v2134_v12  ;;  %v2135_v36 = vmul.f32 -1.442695, %v1043_v45  ;;  %v2136_v47 = vmul.f32 -1.442695, %v1045_v8  ;;  %v3438_v8 = vld [vmem:[#allocation35_spill] sm:$0xff] }
 0x406   :  { %2211 = vpow2.f32 %v2135_v36 }
 0x407   :  { %2213 = vpow2.f32 %v2136_v47 }
 0x411   :  { %v2210_v42 = vpop.eup %2209 }
 0x412   :  { %v1049_v5 = vadd.f32 1.0, %v2210_v42 }
 0x413   :  { %v2212_v44 = vpop.eup %2211 }
 0x414   :  { %2215 = vrcp.f32 %v1049_v5  ;;  %v1055_v41 = vadd.f32 1.0, %v2212_v44  ;;  %v2214_v51 = vpop.eup %2213  ;;  %v3441_v44 = vld [vmem:[#allocation22_spill] sm:$0xff]  ;;  %v3442_v5 = vld [vmem:[#allocation36_spill] sm:$0xff] }
 0x415   :  { %2217 = vtanh.f32 %v1044_v34  ;;  %v1062_v45 = vadd.f32 1.0, %v2214_v51  ;;  %v3440_v34 = vld [vmem:[#allocation28_spill] sm:$0xff]  ;;  %v3446_v51 = vld [vmem:[#allocation37_spill] sm:$0xff] }
 0x416   :  { %2219 = vrcp.f32 %v1055_v41  ;;  %v3437_v41 = vld [vmem:[#allocation21_spill] sm:$0xff] }
 0x417   :  { %2221 = vrcp.f32 %v1062_v45  ;;  %v3450_v45 = vld [vmem:[#allocation38_spill] sm:$0xff] }
 0x421   :  { %v2216_v49 = vpop.eup %2215 }
 0x422   :  { %v2218_v12 = vpop.eup %2217 }
 0x423   :  { %v2220_v22 = vpop.eup %2219  ;;  %v1066_v36 = vmul.f32 %v2218_v12, %v2216_v49  ;;  %v3447_v49 = vld [vmem:[#allocation31_spill] sm:$0xff]  ;;  %v3448_v12 = vld [vmem:[#allocation32_spill] sm:$0xff] }
 0x424   :  { %v1065_v26 = vmul.f32 %v2220_v22, %v2954_v17  ;;  %v2222_v42 = vpop.eup %2221  ;;  %v3439_v17 = vld [vmem:[#allocation27_spill] sm:$0xff]  ;;  %v3449_v22 = vld [vmem:[#allocation24_spill] sm:$0xff] }
 0x426   :  { %v3098_v43 = vadd.f32 %v1066_v36, %v1065_v26  ;;  %v3451_v36 = vld [vmem:[#allocation33_spill] sm:$0xff]  ;;  %v3452_v26 = vld [vmem:[#allocation19_spill] sm:$0xff] }
 0x428   :  { %2223 = vtanh.f32 %v3098_v43 }
 0x435   :  { %v2224_v6 = vpop.eup %2223 }
 0x436   :  { %v1069_v47 = vmul.f32 %v2224_v6, %v2222_v42  ;;  %v3453_v42 = vld [vmem:[#allocation25_spill] sm:$0xff]  ;;  %v3454_v6 = vmov 0.0  }
 0x438   :  { %1071 = vst [vmem:[#allocation10 + $0x18] sm:$0xff] %v1069_v47  ;;  %1215 = vmatmul.mubr.f32.vlgmr.msra.gmra.mxu0 %v1069_v47  ;;  %1286 = vmatmul.mubr.f32.vlgmr.msra.gmra.mxu1 %v1069_v47  ;;  %v3455_v47 = vld [vmem:[#allocation20_spill] sm:$0xff] }
 0x439   :  { %1401 = vmatpush1.msra.mxu0 %v2965_v40  ;;  %1472 = vmatpush1.msra.mxu1 %v2967_v48 }
 0x43a   :  { %1402 = vmatprep.subr.mxu0 %v2971_v53  ;;  %1473 = vmatprep.subr.mxu1 %v2973_v10 }
 0x43b   :  { %1403 = vmatpush1.msra.mxu0 %v2977_v15  ;;  %1474 = vmatpush1.msra.mxu1 %v2979_v20 }
 0x43c   :  { %1404 = vmatprep.subr.mxu0 %v2869_v2  ;;  %1475 = vmatprep.subr.mxu1 %v2983_v24 }
 0x43d   :  { %1405 = vmatpush1.msra.mxu0 %v2872_v3  ;;  %1476 = vmatpush1.msra.mxu1 %v2987_v28 }
 0x43e   :  { %1406 = vmatprep.subr.mxu0 %v2875_v4  ;;  %1477 = vmatprep.subr.mxu1 %v2991_v32 }
 0x43f   :  { %1407 = vmatpush1.msra.mxu0 %v2878_v11  ;;  %1478 = vmatpush1.msra.mxu1 %v2995_v38 }
 0x440   :  { %1408 = vmatprep.subr.mxu0 %v2881_v13  ;;  %1479 = vmatprep.subr.mxu1 %v2999_v54 }
 0x441   :  { %1409 = vmatpush1.msra.mxu0 %v2884_v14  ;;  %1480 = vmatpush1.msra.mxu1 %v3003_v55 }
 0x442   :  { %1410 = vmatprep.subr.mxu0 %v2887_v16  ;;  %1481 = vmatprep.subr.mxu1 %v3007_v57 }
 0x443   :  { %1411 = vmatpush1.msra.mxu0 %v2890_v18  ;;  %1482 = vmatpush1.msra.mxu1 %v3011_v59 }
 0x444   :  { %1412 = vmatprep.subr.mxu0 %v2893_v19  ;;  %1483 = vmatprep.subr.mxu1 %v3015_v56 }
 0x445   :  { %1413 = vmatpush1.msra.mxu0 %v2896_v21  ;;  %1484 = vmatpush1.msra.mxu1 %v3019_v62 }
 0x446   :  { %1414 = vmatprep.subr.mxu0 %v2899_v23  ;;  %1485 = vmatprep.subr.mxu1 %v3023_v52 }
 0x447   :  { %1415 = vmatpush1.msra.mxu0 %v2902_v25  ;;  %1486 = vmatpush1.msra.mxu1 %v3027_v58 }
 0x448   :  { %1416 = vmatprep.subr.mxu0 %v2905_v27  ;;  %1487 = vmatprep.subr.mxu1 %v3031_v50 }
 0x449   :  { %1417 = vmatpush1.msra.mxu0 %v2908_v29  ;;  %1488 = vmatpush1.msra.mxu1 %v3035_v61 }
 0x44a   :  { %1418 = vmatprep.subr.mxu0 %v2911_v31  ;;  %1489 = vmatprep.subr.mxu1 %v3039_v63 }
 0x44b   :  { %1419 = vmatpush1.msra.mxu0 %v2914_v33  ;;  %1490 = vmatpush1.msra.mxu1 %v3043_v60 }
 0x44c   :  { %1420 = vmatprep.subr.mxu0 %v2917_v35  ;;  %1491 = vmatprep.subr.mxu1 %v3047_v0 }
 0x44d   :  { %1421 = vmatpush1.msra.mxu0 %v2920_v37  ;;  %1492 = vmatpush1.msra.mxu1 %v3051_v1 }
 0x44e   :  { %1422 = vmatprep.subr.mxu0 %v2923_v39  ;;  %1493 = vmatprep.subr.mxu1 %v3055_v46 }
 0x44f   :  { %1423 = vmatpush1.msra.mxu0 %v3437_v41  ;;  %1494 = vmatpush1.msra.mxu1 %v3438_v8 }
 0x450   :  { %1424 = vmatprep.subr.mxu0 %v3439_v17  ;;  %1495 = vmatprep.subr.mxu1 %v3440_v34  ;;  %v1084_v34 = vld [vmem:[#allocation2 + $0x90] sm:$0xff] }
 0x451   :  { %1425 = vmatpush1.msra.mxu0 %v3441_v44  ;;  %1496 = vmatpush1.msra.mxu1 %v3442_v5  ;;  %v1085_v5 = vld [vmem:[#allocation2 + $0x98] sm:$0xff] }
 0x452   :  { %1426 = vmatprep.subr.mxu0 %v3443_v7  ;;  %1497 = vmatprep.subr.mxu1 %v3444_v9 }
 0x453   :  { %1427 = vmatpush1.msra.mxu0 %v3445_v30  ;;  %1498 = vmatpush1.msra.mxu1 %v3446_v51  ;;  %v3456_v51 = vld [vmem:[#allocation34_spill] sm:$0xff]  ;;  %v1083_v30 = vld [vmem:[#allocation2 + $0x88] sm:$0xff] }
 0x454   :  { %1428 = vmatprep.subr.mxu0 %v3447_v49  ;;  %1499 = vmatprep.subr.mxu1 %v3448_v12  ;;  %v3457_v49 = vld [vmem:[#allocation26_spill] sm:$0xff]  ;;  %v1082_v12 = vld [vmem:[#allocation2 + $0x80] sm:$0xff] }
 0x455   :  { %1429 = vmatpush1.msra.mxu0 %v3449_v22  ;;  %1500 = vmatpush1.msra.mxu1 %v3450_v45 }
 0x456   :  { %1430 = vmatprep.subr.mxu0 %v3451_v36  ;;  %1501 = vmatprep.subr.mxu1 %v3452_v26 }
 0x457   :  { %1431 = vmatpush1.msra.mxu0 %v3453_v42  ;;  %1464 = vmatprep.mubr.f32.mxu0 %v3454_v6 }
 0x458   :  { %1502 = vmatpush1.msra.mxu1 %v3455_v47  ;;  %1535 = vmatprep.mubr.f32.mxu1 %v3454_v6 }
 0x459   :  { %1650 = vmatprep.subr.mxu0 %v3456_v51  ;;  %1721 = vmatprep.subr.mxu1 %v3457_v49 }
 0x4f8   :  { %v1216_v22 = vpop.f32.mrf.mxu0  ;;  %v1287_v26 = vpop.f32.mrf.mxu1 }
 0x4f9   :  { %v1292_v45 = vadd.f32 %v1216_v22, %v1082_v12  ;;  %v1294_v51 = vadd.f32 %v1287_v26, %v1084_v34 }
 0x4fa   :  { %v1218_v9 = vpop.f32.mrf.mxu0  ;;  %v1289_v44 = vpop.f32.mrf.mxu1 }
 0x4fb   :  { %v2137_v36 = vmul.f32 -1.442695, %v1292_v45  ;;  %v1293_v7 = vadd.f32 %v1218_v9, %v1083_v30  ;;  %v1295_v47 = vadd.f32 %v1289_v44, %v1085_v5 }
 0x4fd   :  { %2225 = vpow2.f32 %v2137_v36  ;;  %v2138_v42 = vmul.f32 -1.442695, %v1293_v7  ;;  %v2139_v6 = vmul.f32 -1.442695, %v1295_v47 }
 0x4ff   :  { %2227 = vpow2.f32 %v2138_v42 }
 0x500   :  { %2229 = vpow2.f32 %v2139_v6 }
 0x50a   :  { %v2226_v17 = vpop.eup %2225 }
 0x50b   :  { %v1299_v8 = vadd.f32 1.0, %v2226_v17 }
 0x50c   :  { %v2228_v49 = vpop.eup %2227 }
 0x50d   :  { %2231 = vrcp.f32 %v1299_v8  ;;  %v1305_v41 = vadd.f32 1.0, %v2228_v49  ;;  %v2230_v12 = vpop.eup %2229  ;;  %v1332_v8 = vld [vmem:[#allocation2 + $0xa0] sm:$0xff]  ;;  %v1333_v49 = vld [vmem:[#allocation2 + $0xa8] sm:$0xff] }
 0x50e   :  { %2233 = vtanh.f32 %v1294_v51  ;;  %v1312_v7 = vadd.f32 1.0, %v2230_v12 }
 0x50f   :  { %2235 = vrcp.f32 %v1305_v41  ;;  %v3478_v41 = vld [vmem:[#allocation26_spill] sm:$0xff] }
 0x510   :  { %2237 = vrcp.f32 %v1312_v7 }
 0x51a   :  { %v2232_v9 = vpop.eup %2231 }
 0x51b   :  { %v2234_v30 = vpop.eup %2233 }
 0x51c   :  { %v2236_v22 = vpop.eup %2235  ;;  %v1316_v45 = vmul.f32 %v2234_v30, %v2232_v9  ;;  %v1335_v30 = vld [vmem:[#allocation2 + $0xb8] sm:$0xff] }
 0x51d   :  { %v1315_v36 = vmul.f32 %v2236_v22, %v3098_v43  ;;  %v2238_v17 = vpop.eup %2237  ;;  %v3477_v43 = vld [vmem:[#allocation34_spill] sm:$0xff] }
 0x51f   :  { %v3168_v44 = vadd.f32 %v1316_v45, %v1315_v36  ;;  %v1334_v45 = vld [vmem:[#allocation2 + $0xb0] sm:$0xff] }
 0x521   :  { %2239 = vtanh.f32 %v3168_v44 }
 0x52e   :  { %v2240_v34 = vpop.eup %2239 }
 0x52f   :  { %v1319_v5 = vmul.f32 %v2240_v34, %v2238_v17 }
 0x531   :  { %1321 = vst [vmem:[#allocation10 + $0x20] sm:$0xff] %v1319_v5  ;;  %1465 = vmatmul.mubr.f32.vlgmr.msra.gmra.mxu0 %v1319_v5  ;;  %1536 = vmatmul.mubr.f32.vlgmr.msra.gmra.mxu1 %v1319_v5 }
 0x532   :  { %1651 = vmatpush1.msra.mxu0 %v2965_v40  ;;  %1722 = vmatpush1.msra.mxu1 %v2967_v48 }
 0x533   :  { %1652 = vmatprep.subr.mxu0 %v2971_v53  ;;  %1723 = vmatprep.subr.mxu1 %v2973_v10 }
 0x534   :  { %1653 = vmatpush1.msra.mxu0 %v2977_v15  ;;  %1724 = vmatpush1.msra.mxu1 %v2979_v20 }
 0x535   :  { %1654 = vmatprep.subr.mxu0 %v2869_v2  ;;  %1725 = vmatprep.subr.mxu1 %v2983_v24  ;;  %v3458_v2 = vld [vmem:[#allocation21_spill] sm:$0xff] }
 0x536   :  { %1655 = vmatpush1.msra.mxu0 %v2872_v3  ;;  %1726 = vmatpush1.msra.mxu1 %v2987_v28  ;;  %v3459_v3 = vld [vmem:[#allocation35_spill] sm:$0xff] }
 0x537   :  { %1656 = vmatprep.subr.mxu0 %v2875_v4  ;;  %1727 = vmatprep.subr.mxu1 %v2991_v32  ;;  %v3460_v4 = vld [vmem:[#allocation27_spill] sm:$0xff] }
 0x538   :  { %1657 = vmatpush1.msra.mxu0 %v2878_v11  ;;  %1728 = vmatpush1.msra.mxu1 %v2995_v38  ;;  %v3461_v11 = vld [vmem:[#allocation28_spill] sm:$0xff] }
 0x539   :  { %1658 = vmatprep.subr.mxu0 %v2881_v13  ;;  %1729 = vmatprep.subr.mxu1 %v2999_v54  ;;  %v3462_v13 = vld [vmem:[#allocation22_spill] sm:$0xff] }
 0x53a   :  { %1659 = vmatpush1.msra.mxu0 %v2884_v14  ;;  %1730 = vmatpush1.msra.mxu1 %v3003_v55  ;;  %v3463_v14 = vld [vmem:[#allocation36_spill] sm:$0xff] }
 0x53b   :  { %1660 = vmatprep.subr.mxu0 %v2887_v16  ;;  %1731 = vmatprep.subr.mxu1 %v3007_v57  ;;  %v3464_v16 = vld [vmem:[#allocation29_spill] sm:$0xff] }
 0x53c   :  { %1661 = vmatpush1.msra.mxu0 %v2890_v18  ;;  %1732 = vmatpush1.msra.mxu1 %v3011_v59  ;;  %v3465_v18 = vld [vmem:[#allocation30_spill] sm:$0xff] }
 0x53d   :  { %1662 = vmatprep.subr.mxu0 %v2893_v19  ;;  %1733 = vmatprep.subr.mxu1 %v3015_v56  ;;  %v3466_v19 = vld [vmem:[#allocation23_spill] sm:$0xff] }
 0x53e   :  { %1663 = vmatpush1.msra.mxu0 %v2896_v21  ;;  %1734 = vmatpush1.msra.mxu1 %v3019_v62  ;;  %v3467_v21 = vld [vmem:[#allocation37_spill] sm:$0xff] }
 0x53f   :  { %1664 = vmatprep.subr.mxu0 %v2899_v23  ;;  %1735 = vmatprep.subr.mxu1 %v3023_v52  ;;  %v3468_v23 = vld [vmem:[#allocation31_spill] sm:$0xff] }
 0x540   :  { %1665 = vmatpush1.msra.mxu0 %v2902_v25  ;;  %1736 = vmatpush1.msra.mxu1 %v3027_v58  ;;  %v3469_v25 = vld [vmem:[#allocation32_spill] sm:$0xff] }
 0x541   :  { %1666 = vmatprep.subr.mxu0 %v2905_v27  ;;  %1737 = vmatprep.subr.mxu1 %v3031_v50  ;;  %v3470_v27 = vld [vmem:[#allocation24_spill] sm:$0xff] }
 0x542   :  { %1667 = vmatpush1.msra.mxu0 %v2908_v29  ;;  %1738 = vmatpush1.msra.mxu1 %v3035_v61  ;;  %v3471_v29 = vld [vmem:[#allocation38_spill] sm:$0xff] }
 0x543   :  { %1668 = vmatprep.subr.mxu0 %v2911_v31  ;;  %1739 = vmatprep.subr.mxu1 %v3039_v63  ;;  %v3472_v31 = vld [vmem:[#allocation33_spill] sm:$0xff] }
 0x544   :  { %1669 = vmatpush1.msra.mxu0 %v2914_v33  ;;  %1740 = vmatpush1.msra.mxu1 %v3043_v60  ;;  %v3473_v33 = vld [vmem:[#allocation19_spill] sm:$0xff] }
 0x545   :  { %1670 = vmatprep.subr.mxu0 %v2917_v35  ;;  %1741 = vmatprep.subr.mxu1 %v3047_v0  ;;  %v3474_v35 = vld [vmem:[#allocation25_spill] sm:$0xff] }
 0x546   :  { %1671 = vmatpush1.msra.mxu0 %v2920_v37  ;;  %1742 = vmatpush1.msra.mxu1 %v3051_v1  ;;  %v3475_v37 = vmov 0.0  }
 0x547   :  { %1672 = vmatprep.subr.mxu0 %v2923_v39  ;;  %1743 = vmatprep.subr.mxu1 %v3055_v46  ;;  %v3476_v39 = vld [vmem:[#allocation20_spill] sm:$0xff] }
 0x548   :  { %1673 = vmatpush1.msra.mxu0 %v3458_v2  ;;  %1744 = vmatpush1.msra.mxu1 %v3459_v3 }
 0x549   :  { %1674 = vmatprep.subr.mxu0 %v3460_v4  ;;  %1745 = vmatprep.subr.mxu1 %v3461_v11 }
 0x54a   :  { %1675 = vmatpush1.msra.mxu0 %v3462_v13  ;;  %1746 = vmatpush1.msra.mxu1 %v3463_v14 }
 0x54b   :  { %1676 = vmatprep.subr.mxu0 %v3464_v16  ;;  %1747 = vmatprep.subr.mxu1 %v3465_v18 }
 0x54c   :  { %1677 = vmatpush1.msra.mxu0 %v3466_v19  ;;  %1748 = vmatpush1.msra.mxu1 %v3467_v21 }
 0x54d   :  { %1678 = vmatprep.subr.mxu0 %v3468_v23  ;;  %1749 = vmatprep.subr.mxu1 %v3469_v25 }
 0x54e   :  { %1679 = vmatpush1.msra.mxu0 %v3470_v27  ;;  %1750 = vmatpush1.msra.mxu1 %v3471_v29 }
 0x54f   :  { %1680 = vmatprep.subr.mxu0 %v3472_v31  ;;  %1751 = vmatprep.subr.mxu1 %v3473_v33 }
 0x550   :  { %1681 = vmatpush1.msra.mxu0 %v3474_v35  ;;  %1714 = vmatprep.mubr.f32.mxu0 %v3475_v37 }
 0x551   :  { %1752 = vmatpush1.msra.mxu1 %v3476_v39  ;;  %1785 = vmatprep.mubr.f32.mxu1 %v3475_v37 }
 0x552   :  { %1900 = vmatprep.subr.mxu0 %v3477_v43  ;;  %1971 = vmatprep.subr.mxu1 %v3478_v41 }
 0x5f1   :  { %v1466_v51 = vpop.f32.mrf.mxu0  ;;  %v1537_v12 = vpop.f32.mrf.mxu1 }
 0x5f2   :  { %v1542_v26 = vadd.f32 %v1466_v51, %v1332_v8  ;;  %v1544_v34 = vadd.f32 %v1537_v12, %v1334_v45 }
 0x5f3   :  { %v1468_v42 = vpop.f32.mrf.mxu0  ;;  %v1539_v22 = vpop.f32.mrf.mxu1 }
 0x5f4   :  { %v2140_v6 = vmul.f32 -1.442695, %v1542_v26  ;;  %v1543_v47 = vadd.f32 %v1468_v42, %v1333_v49  ;;  %v1545_v7 = vadd.f32 %v1539_v22, %v1335_v30  ;;  %v1585_v26 = vld [vmem:[#allocation2 + $0xd8] sm:$0xff] }
 0x5f6   :  { %2241 = vpow2.f32 %v2140_v6  ;;  %v2141_v9 = vmul.f32 -1.442695, %v1543_v47  ;;  %v2142_v36 = vmul.f32 -1.442695, %v1545_v7  ;;  %v1584_v47 = vld [vmem:[#allocation2 + $0xd0] sm:$0xff] }
 0x5f8   :  { %2243 = vpow2.f32 %v2141_v9 }
 0x5f9   :  { %2245 = vpow2.f32 %v2142_v36 }
 0x603   :  { %v2242_v17 = vpop.eup %2241 }
 0x604   :  { %v1549_v5 = vadd.f32 1.0, %v2242_v17 }
 0x605   :  { %v2244_v2 = vpop.eup %2243 }
 0x606   :  { %2247 = vrcp.f32 %v1549_v5  ;;  %v1555_v4 = vadd.f32 1.0, %v2244_v2  ;;  %v2246_v13 = vpop.eup %2245 }
 0x607   :  { %2249 = vtanh.f32 %v1544_v34  ;;  %v1562_v27 = vadd.f32 1.0, %v2246_v13 }
 0x608   :  { %2251 = vrcp.f32 %v1555_v4 }
 0x609   :  { %2253 = vrcp.f32 %v1562_v27 }
 0x613   :  { %v2248_v16 = vpop.eup %2247 }
 0x614   :  { %v2250_v19 = vpop.eup %2249 }
 0x615   :  { %v2252_v23 = vpop.eup %2251  ;;  %v1566_v31 = vmul.f32 %v2250_v19, %v2248_v16 }
 0x616   :  { %v1565_v35 = vmul.f32 %v2252_v23, %v3168_v44  ;;  %v2254_v41 = vpop.eup %2253  ;;  %v1840_v44 = vld [vmem:[#allocation5 + $0x20] sm:$0xff] }
 0x618   :  { %v3238_v43 = vadd.f32 %v1566_v31, %v1565_v35 }
 0x61a   :  { %2255 = vtanh.f32 %v3238_v43 }
 0x627   :  { %v2256_v8 = vpop.eup %2255 }
 0x628   :  { %v1569_v51 = vmul.f32 %v2256_v8, %v2254_v41 }
 0x62a   :  { %1571 = vst [vmem:[#allocation10 + $0x28] sm:$0xff] %v1569_v51  ;;  %1715 = vmatmul.mubr.f32.vlgmr.msra.gmra.mxu0 %v1569_v51  ;;  %1786 = vmatmul.mubr.f32.vlgmr.msra.gmra.mxu1 %v1569_v51 }
 0x62b   :  { %1901 = vmatpush1.msra.mxu0 %v2965_v40  ;;  %1972 = vmatpush1.msra.mxu1 %v2967_v48  ;;  %v1889_v40 = vld [vmem:[#allocation5 + $0x1a8] sm:$0xff]  ;;  %v1888_v48 = vld [vmem:[#allocation5 + $0x1a0] sm:$0xff] }
 0x62c   :  { %1902 = vmatprep.subr.mxu0 %v2971_v53  ;;  %1973 = vmatprep.subr.mxu1 %v2973_v10  ;;  %v1885_v53 = vld [vmem:[#allocation5 + $0x188] sm:$0xff]  ;;  %v1884_v10 = vld [vmem:[#allocation5 + $0x180] sm:$0xff] }
 0x62d   :  { %1903 = vmatpush1.msra.mxu0 %v2977_v15  ;;  %1974 = vmatpush1.msra.mxu1 %v2979_v20  ;;  %v1881_v15 = vld [vmem:[#allocation5 + $0x168] sm:$0xff]  ;;  %v1880_v20 = vld [vmem:[#allocation5 + $0x160] sm:$0xff] }
 0x62e   :  { %1975 = vmatprep.subr.mxu1 %v2983_v24  ;;  %1964 = vmatprep.mubr.f32.mxu0 %v3475_v37  ;;  %v1877_v24 = vld [vmem:[#allocation5 + $0x148] sm:$0xff] }
 0x62f   :  { %1976 = vmatpush1.msra.mxu1 %v2987_v28  ;;  %2035 = vmatprep.mubr.f32.mxu1 %v3475_v37  ;;  %v1876_v28 = vld [vmem:[#allocation5 + $0x140] sm:$0xff] }
 0x630   :  { %1977 = vmatprep.subr.mxu1 %v2991_v32  ;;  %1904 = vmatprep.subr.mxu0 %v1889_v40  ;;  %v1873_v32 = vld [vmem:[#allocation5 + $0x128] sm:$0xff] }
 0x631   :  { %1978 = vmatpush1.msra.mxu1 %v2995_v38  ;;  %1905 = vmatpush1.msra.mxu0 %v1888_v48  ;;  %v1872_v38 = vld [vmem:[#allocation5 + $0x120] sm:$0xff] }
 0x632   :  { %1979 = vmatprep.subr.mxu1 %v2999_v54  ;;  %1906 = vmatprep.subr.mxu0 %v1885_v53  ;;  %v1869_v54 = vld [vmem:[#allocation5 + $0x108] sm:$0xff] }
 0x633   :  { %1980 = vmatpush1.msra.mxu1 %v3003_v55  ;;  %1907 = vmatpush1.msra.mxu0 %v1884_v10  ;;  %v1868_v55 = vld [vmem:[#allocation5 + $0x100] sm:$0xff] }
 0x634   :  { %1981 = vmatprep.subr.mxu1 %v3007_v57  ;;  %1908 = vmatprep.subr.mxu0 %v1881_v15  ;;  %v1865_v57 = vld [vmem:[#allocation5 + $0xe8] sm:$0xff] }
 0x635   :  { %1982 = vmatpush1.msra.mxu1 %v3011_v59  ;;  %1909 = vmatpush1.msra.mxu0 %v1880_v20  ;;  %v1864_v59 = vld [vmem:[#allocation5 + $0xe0] sm:$0xff] }
 0x636   :  { %1983 = vmatprep.subr.mxu1 %v3015_v56  ;;  %1910 = vmatprep.subr.mxu0 %v1877_v24  ;;  %v1861_v56 = vld [vmem:[#allocation5 + $0xc8] sm:$0xff] }
 0x637   :  { %1984 = vmatpush1.msra.mxu1 %v3019_v62  ;;  %1911 = vmatpush1.msra.mxu0 %v1876_v28  ;;  %v1860_v62 = vld [vmem:[#allocation5 + $0xc0] sm:$0xff] }
 0x638   :  { %1985 = vmatprep.subr.mxu1 %v3023_v52  ;;  %1912 = vmatprep.subr.mxu0 %v1873_v32  ;;  %v1857_v52 = vld [vmem:[#allocation5 + $0xa8] sm:$0xff] }
 0x639   :  { %1986 = vmatpush1.msra.mxu1 %v3027_v58  ;;  %1913 = vmatpush1.msra.mxu0 %v1872_v38  ;;  %v1856_v58 = vld [vmem:[#allocation5 + $0xa0] sm:$0xff] }
 0x63a   :  { %1987 = vmatprep.subr.mxu1 %v3031_v50  ;;  %1914 = vmatprep.subr.mxu0 %v1869_v54  ;;  %v1853_v50 = vld [vmem:[#allocation5 + $0x88] sm:$0xff] }
 0x63b   :  { %1988 = vmatpush1.msra.mxu1 %v3035_v61  ;;  %1915 = vmatpush1.msra.mxu0 %v1868_v55  ;;  %v1852_v61 = vld [vmem:[#allocation5 + $0x80] sm:$0xff] }
 0x63c   :  { %1989 = vmatprep.subr.mxu1 %v3039_v63  ;;  %1916 = vmatprep.subr.mxu0 %v1865_v57  ;;  %v1849_v63 = vld [vmem:[#allocation5 + $0x68] sm:$0xff] }
 0x63d   :  { %1990 = vmatpush1.msra.mxu1 %v3043_v60  ;;  %1917 = vmatpush1.msra.mxu0 %v1864_v59  ;;  %v1848_v60 = vld [vmem:[#allocation5 + $0x60] sm:$0xff] }
 0x63e   :  { %1991 = vmatprep.subr.mxu1 %v3047_v0  ;;  %1918 = vmatprep.subr.mxu0 %v1861_v56  ;;  %v1845_v0 = vld [vmem:[#allocation5 + $0x48] sm:$0xff] }
 0x63f   :  { %1992 = vmatpush1.msra.mxu1 %v3051_v1  ;;  %1919 = vmatpush1.msra.mxu0 %v1860_v62  ;;  %v1844_v1 = vld [vmem:[#allocation5 + $0x40] sm:$0xff] }
 0x640   :  { %1993 = vmatprep.subr.mxu1 %v3055_v46  ;;  %1920 = vmatprep.subr.mxu0 %v1857_v52  ;;  %v1841_v46 = vld [vmem:[#allocation5 + $0x28] sm:$0xff] }
 0x641   :  { %1994 = vmatpush1.msra.mxu1 %v3459_v3  ;;  %1921 = vmatpush1.msra.mxu0 %v1856_v58  ;;  %v1837_v3 = vld [vmem:[#allocation5 + $0x8] sm:$0xff] }
 0x642   :  { %1995 = vmatprep.subr.mxu1 %v3461_v11  ;;  %1922 = vmatprep.subr.mxu0 %v1853_v50  ;;  %v1836_v11 = vld [vmem:[#allocation5] sm:$0xff] }
 0x643   :  { %1996 = vmatpush1.msra.mxu1 %v3463_v14  ;;  %1923 = vmatpush1.msra.mxu0 %v1852_v61  ;;  %v1582_v14 = vld [vmem:[#allocation2 + $0xc0] sm:$0xff] }
 0x644   :  { %1997 = vmatprep.subr.mxu1 %v3465_v18  ;;  %1924 = vmatprep.subr.mxu0 %v1849_v63 }
 0x645   :  { %1998 = vmatpush1.msra.mxu1 %v3467_v21  ;;  %1925 = vmatpush1.msra.mxu0 %v1848_v60  ;;  %v1583_v21 = vld [vmem:[#allocation2 + $0xc8] sm:$0xff] }
 0x646   :  { %1999 = vmatprep.subr.mxu1 %v3469_v25  ;;  %1926 = vmatprep.subr.mxu0 %v1845_v0 }
 0x647   :  { %2000 = vmatpush1.msra.mxu1 %v3471_v29  ;;  %1927 = vmatpush1.msra.mxu0 %v1844_v1 }
 0x648   :  { %2001 = vmatprep.subr.mxu1 %v3473_v33  ;;  %1928 = vmatprep.subr.mxu0 %v1841_v46 }
 0x649   :  { %2002 = vmatpush1.msra.mxu1 %v3476_v39  ;;  %1929 = vmatpush1.msra.mxu0 %v1840_v44 }
 0x64a   :  { %1930 = vmatprep.subr.mxu0 %v1837_v3 }
 0x64b   :  { %1931 = vmatpush1.msra.mxu0 %v1836_v11 }
 0x6ea   :  { %v1716_v18 = vpop.f32.mrf.mxu0  ;;  %v1787_v39 = vpop.f32.mrf.mxu1 }
 0x6eb   :  { %v1792_v25 = vadd.f32 %v1716_v18, %v1582_v14  ;;  %v1794_v30 = vadd.f32 %v1787_v39, %v1584_v47 }
 0x6ec   :  { %v1718_v29 = vpop.f32.mrf.mxu0  ;;  %v1789_v42 = vpop.f32.mrf.mxu1 }
 0x6ed   :  { %v2143_v33 = vmul.f32 -1.442695, %v1792_v25  ;;  %v1793_v37 = vadd.f32 %v1718_v29, %v1583_v21  ;;  %v1795_v6 = vadd.f32 %v1789_v42, %v1585_v26 }
 0x6ef   :  { %2257 = vpow2.f32 %v2143_v33  ;;  %v2144_v49 = vmul.f32 -1.442695, %v1793_v37  ;;  %v2145_v12 = vmul.f32 -1.442695, %v1795_v6 }
 0x6f1   :  { %2259 = vpow2.f32 %v2144_v49 }
 0x6f2   :  { %2261 = vpow2.f32 %v2145_v12 }
 0x6fc   :  { %v2258_v9 = vpop.eup %2257 }
 0x6fd   :  { %v1799_v22 = vadd.f32 1.0, %v2258_v9 }
 0x6fe   :  { %v2260_v7 = vpop.eup %2259 }
 0x6ff   :  { %2263 = vrcp.f32 %v1799_v22  ;;  %v1805_v45 = vadd.f32 1.0, %v2260_v7  ;;  %v2262_v36 = vpop.eup %2261 }
 0x700   :  { %2265 = vtanh.f32 %v1794_v30  ;;  %v1812_v2 = vadd.f32 1.0, %v2262_v36 }
 0x701   :  { %2267 = vrcp.f32 %v1805_v45 }
 0x702   :  { %2269 = vrcp.f32 %v1812_v2 }
 0x70c   :  { %v2264_v17 = vpop.eup %2263 }
 0x70d   :  { %v2266_v34 = vpop.eup %2265 }
 0x70e   :  { %v2268_v5 = vpop.eup %2267  ;;  %v1816_v4 = vmul.f32 %v2266_v34, %v2264_v17 }
 0x70f   :  { %v1815_v13 = vmul.f32 %v2268_v5, %v3238_v43  ;;  %v2270_v19 = vpop.eup %2269 }
 0x711   :  { %v3278_v16 = vadd.f32 %v1816_v4, %v1815_v13 }
 0x713   :  { %2271 = vtanh.f32 %v3278_v16  ;;  %1828 = vst [vmem:[#allocation13] sm:$0xff] %v3278_v16 }
 0x720   :  { %v2272_v23 = vpop.eup %2271 }
 0x721   :  { %v1819_v27 = vmul.f32 %v2272_v23, %v2270_v19 }
 0x723   :  { %1821 = vst [vmem:[#allocation10 + $0x30] sm:$0xff] %v1819_v27  ;;  %1827 = vst [vmem:[#allocation11] sm:$0xff] %v1819_v27  ;;  %1965 = vmatmul.mubr.f32.vlgmr.msra.gmra.mxu0 %v1819_v27  ;;  %2036 = vmatmul.mubr.f32.vlgmr.msra.gmra.mxu1 %v1819_v27 }
 0x724   :  { %2380 = shalt.err (!%p2377_p10)
}
 0x725   :  { %2100 = dma.vmem_to_hbm [thread:$0]  %s2098_s3, 128, %s3297_s5, [#allocation12]  }
 0x726   :  { %s2447_s20 = smov [#allocation13]  }
 0x727   :  { %s2107_s21 = sshll.u32 %s2447_s20, 4  ;;  %s2108_s21 = int_to_ptr.vmem [resolvable:$true] %s2107_s21 }
 0x728   :  { %s2389_s22 = scalar_lea.vmem %s2108_s21, 128  ;;  %p2394_p12 = scmp.lt.s32.totalorder %s2108_s21, %s2108_s21 }
 0x729   :  { %p2390_p11 = scmp.ne.s32.totalorder %s2108_s21, %s2389_s22  ;;  %p2395_p13 = scmp.lt.s32.totalorder %s2389_s22, %s2389_s22 }
 0x72b   :  { %p2396_p0 = por %p2395_p13, %p2394_p12 }
 0x72d   :  { %p2397_p1 = pnand %p2396_p0, %p2390_p11 }
 0x72f   :  { %2400 = shalt.err (!%p2397_p1)
}
 0x730   :  { %2110 = dma.vmem_to_hbm [thread:$0]  %s2108_s21, 128, %s3298_s6, [#allocation12]   ;;  %v1832_v31 = vld [vmem:[#allocation2 + $0xe0] sm:$0xff]  ;;  %v1833_v43 = vld [vmem:[#allocation2 + $0xe8] sm:$0xff]  ;;  %v1835_v10 = vld [vmem:[#allocation2 + $0xf8] sm:$0xff] }
 0x731   :  { %v1834_v24 = vld [vmem:[#allocation2 + $0xf0] sm:$0xff]  ;;  %s2448_s5 = smov [#allocation10]  }
 0x732   :  { %s2084_s6 = sshll.u32 %s2448_s5, 4  ;;  %s2085_s6 = int_to_ptr.vmem [resolvable:$true] %s2084_s6 }
 0x733   :  { %s2409_s25 = scalar_lea.vmem %s2085_s6, 1024  ;;  %p2414_p3 = scmp.lt.s32.totalorder %s2085_s6, %s2085_s6 }
 0x734   :  { %p2410_p2 = scmp.ne.s32.totalorder %s2085_s6, %s2409_s25  ;;  %p2415_p4 = scmp.lt.s32.totalorder %s2409_s25, %s2409_s25 }
 0x736   :  { %p2416_p5 = por %p2415_p4, %p2414_p3 }
 0x738   :  { %p2417_p6 = pnand %p2416_p5, %p2410_p2 }
 0x7e3   :  { %v1966_v35 = vpop.f32.mrf.mxu0  ;;  %v2037_v48 = vpop.f32.mrf.mxu1 }
 0x7e4   :  { %v2042_v41 = vadd.f32 %v1966_v35, %v1832_v31  ;;  %v2044_v38 = vadd.f32 %v2037_v48, %v1834_v24 }
 0x7e5   :  { %v1968_v8 = vpop.f32.mrf.mxu0  ;;  %v2039_v15 = vpop.f32.mrf.mxu1 }
 0x7e6   :  { %v2146_v51 = vmul.f32 -1.442695, %v2042_v41  ;;  %v2043_v40 = vadd.f32 %v1968_v8, %v1833_v43  ;;  %v2045_v20 = vadd.f32 %v2039_v15, %v1835_v10 }
 0x7e8   :  { %2273 = vpow2.f32 %v2146_v51  ;;  %v2147_v53 = vmul.f32 -1.442695, %v2043_v40  ;;  %v2148_v28 = vmul.f32 -1.442695, %v2045_v20 }
 0x7ea   :  { %2275 = vpow2.f32 %v2147_v53 }
 0x7eb   :  { %2277 = vpow2.f32 %v2148_v28 }
 0x7f5   :  { %v2274_v32 = vpop.eup %2273 }
 0x7f6   :  { %v2049_v54 = vadd.f32 1.0, %v2274_v32 }
 0x7f7   :  { %v2276_v55 = vpop.eup %2275 }
 0x7f8   :  { %2279 = vrcp.f32 %v2049_v54  ;;  %v2055_v57 = vadd.f32 1.0, %v2276_v55  ;;  %v2278_v59 = vpop.eup %2277 }
 0x7f9   :  { %2281 = vtanh.f32 %v2044_v38  ;;  %v2062_v58 = vadd.f32 1.0, %v2278_v59 }
 0x7fa   :  { %2283 = vrcp.f32 %v2055_v57 }
 0x7fb   :  { %2285 = vrcp.f32 %v2062_v58 }
 0x805   :  { %v2280_v56 = vpop.eup %2279 }
 0x806   :  { %v2282_v62 = vpop.eup %2281 }
 0x807   :  { %v2284_v52 = vpop.eup %2283  ;;  %v2066_v50 = vmul.f32 %v2282_v62, %v2280_v56 }
 0x808   :  { %v2065_v61 = vmul.f32 %v2284_v52, %v3278_v16  ;;  %v2286_v60 = vpop.eup %2285 }
 0x80a   :  { %v2067_v63 = vadd.f32 %v2066_v50, %v2065_v61 }
 0x80c   :  { %2287 = vtanh.f32 %v2067_v63 }
 0x819   :  { %v2288_v0 = vpop.eup %2287 }
 0x81a   :  { %v2069_v1 = vmul.f32 %v2288_v0, %v2286_v60 }
 0x81c   :  { %2071 = vst [vmem:[#allocation10 + $0x38] sm:$0xff] %v2069_v1 }
 0x81d   :  { %2420 = shalt.err (!%p2417_p6)
}
 0x81e   :  { %s2449_s26 = smov 128   ;;  %s2450_s27 = smov 8  }
 0x81f   :  { %2090 = dma.vmem_to_hbm [thread:$0]  %s2085_s6, 1024, %s3296_s4, [#allocation4], %s2449_s26, %s2449_s26, %s2450_s27  }
 0x820   :  { %2435 = dma.done.wait [#allocation4], 1024  }
 0x821   :  { %2436 = vsyncadd [#allocation4], 4294966272 }
 0x822   :  { %2437 = dma.done.wait [#allocation12], 256  }
 0x823   :  { %2438 = vsyncadd [#allocation12], 4294967040 }
 0x824   :  { %2120 = vsyncpa [#allocation3], 1 }
 0x825   :  { %2121 = vsyncpa [#allocation6], 1 }
 0x826   :  { %2122 = vsyncpa [#allocation9], 1 }
 0x827   :  { %2123 = vsyncpa [#allocation4], 1 }
 0x828   :  { %2124 = vsyncpa [#allocation12], 1 }

</bundles_post_ra>
